<compile_context>
chip_gen: v5e
topology: v5e:2x2
jax: 0.10.0
libtpu: 0.0.40
codegen_flags: <defaults>
</compile_context>

<pallas_src>
import functools
import math

import jax
import jax.numpy as jnp
from jax.experimental import pallas as pl
from jax.experimental.pallas import tpu as pltpu


def _round_up(n, m):
    return ((n + m - 1) // m) * m


def sent_level_kernel(xcat_ref, wi_ref, whh_ref, gbias_ref, watt_ref, batt_ref,
                      bsum_ref, out_ref, hid_ref, *, S0p, S1, H, C):
    f32 = jnp.float32
    D2 = 2 * H            # bidirectional feature width

    def dot(a, b):
        return jnp.dot(a, b, preferred_element_type=f32)

    # ---- one-shot input projections: all timesteps, both directions, all gates ----
    bi = gbias_ref[0:1, :]                                   # (1, 6H) x-side gate biases
    bh = gbias_ref[1:2, :]                                   # (1, 6H) h-side bias (b_hn only)
    gx_all = dot(xcat_ref[...], wi_ref[...]) + bi            # (R, 6H) off the serial chain
    whh = whh_ref[...]                                       # (2H, 6H) block-diag fused W_hh

    # ---- fused bidirectional GRU: one MXU op per timestep on the serial chain ----
    # 6H gate-column layout: [r_f, r_b, z_f, z_b, n_f, n_b]; h columns: [h_fwd | h_bwd]
    h = jnp.zeros((S0p, D2), f32)
    for i in range(S1):
        gx = gx_all[i * S0p:(i + 1) * S0p, :]   # fwd uses x[:, i], bwd uses x[:, S1-1-i]
        gh = dot(h, whh) + bh                                # (S0p, 6H)
        rz = jax.nn.sigmoid(gx[:, :2 * D2] + gh[:, :2 * D2])
        r = rz[:, :D2]
        z = rz[:, D2:]
        n = jnp.tanh(gx[:, 2 * D2:] + r * gh[:, 2 * D2:])
        h = (1.0 - z) * n + z * h
        # time-aligned (R, 2H) layout; row blocks are 8-aligned thanks to S0 padding
        hid_ref[i * S0p:(i + 1) * S0p, 0:H] = h[:, :H]               # fwd output @ time i
        hid_ref[(S1 - 1 - i) * S0p:(S1 - i) * S0p, H:D2] = h[:, H:]  # bwd output @ time S1-1-i

    # ---- batched attention + classifier (all timesteps at once, 4 MXU ops) ----
    h_cat = hid_ref[...]                                     # (R, 2H) time-aligned
    wlin = watt_ref[:, 0:D2]                                 # (2H, 2H)
    ctx = watt_ref[:, D2:D2 + 1]                             # (2H, 1)
    wfc = watt_ref[:, D2 + 1:D2 + 1 + C]                     # (2H, C)
    blin = batt_ref[:, 0:D2]                                 # (1, 2H)
    bfc = batt_ref[:, D2:D2 + C]                             # (1, C)

    u = jnp.tanh(dot(h_cat, wlin) + blin)                    # (R, 2H)
    score = dot(u, ctx)                                      # (R, 1)
    # per-timestep softmax over the valid S0 rows of each block; shift-invariant, so
    # one global max is enough for stability at these scales.
    e = jnp.exp(score - jnp.max(score, axis=0, keepdims=True))

    # Fused block-sum: softmax denominators and weighted hidden sums in ONE matmul.
    # bsum[t, r] = 1 iff flat row r belongs to timestep t AND is not a pad row.
    fused = dot(bsum_ref[...], jnp.concatenate([e, h_cat * e], axis=1))   # (S1, 1+2H)
    inv = 1.0 / fused[:, 0:1]                                # exact (S1 tiny divides)
    s = fused[:, 1:1 + D2] * inv                             # (S1, 2H) attention output
    out_ref[...] = dot(s, wfc) + bfc                         # single dense (S1, C) store


def pack_params(p, *, H, IN, C, S0, S1):
    """One-time parameter preprocessing (runs ONCE at init, outside the per-call jit)."""
    D2, G6 = 2 * H, 6 * H
    S0p = _round_up(S0, 8)
    R = S1 * S0p

    w_ih, w_hh, b_ih, b_hh = p["w_ih"], p["w_hh"], p["b_ih"], p["b_hh"]

    def gate_w(w, d, g):                     # (2, 3H, K) -> (K, H); PyTorch gate order r,z,n
        return w[d, g * H:(g + 1) * H, :].T

    wi_blk = jnp.zeros((2 * IN, G6), jnp.float32)    # rows: [x_fwd | x_rev]
    whh_blk = jnp.zeros((D2, G6), jnp.float32)       # rows: [h_fwd | h_bwd]
    bi = jnp.zeros((G6,), jnp.float32)
    bh = jnp.zeros((G6,), jnp.float32)
    for g in range(3):                               # 0=r, 1=z, 2=n
        for d in range(2):                           # 0=fwd, 1=bwd
            c = (2 * g + d) * H                      # gate-major, direction-minor columns
            wi_blk = wi_blk.at[d * IN:(d + 1) * IN, c:c + H].set(gate_w(w_ih, d, g))
            whh_blk = whh_blk.at[d * H:(d + 1) * H, c:c + H].set(gate_w(w_hh, d, g))
            if g < 2:        # r, z: both biases fold onto the x side
                bi = bi.at[c:c + H].set(b_ih[d, g * H:(g + 1) * H]
                                        + b_hh[d, g * H:(g + 1) * H])
            else:            # n: b_in on the x side, b_hn stays inside r * (...)
                bi = bi.at[c:c + H].set(b_ih[d, g * H:(g + 1) * H])
                bh = bh.at[c:c + H].set(b_hh[d, g * H:(g + 1) * H])
    gru_bias = jnp.stack([bi, bh], axis=0)           # (2, 6H)

    watt = jnp.concatenate([p["lin_w"].T, p["ctx"], p["fc_w"].T], axis=1)       # (2H, 2H+1+C)
    batt = jnp.concatenate([p["lin_b"][None, :], p["fc_b"][None, :]], axis=1)   # (1, 2H+C)

    # Precomputed block-summing matrix with the pad-row mask folded in.
    rows = jnp.arange(S1, dtype=jnp.int32)[:, None]
    cols = jnp.arange(R, dtype=jnp.int32)[None, :]
    bsum = ((cols // S0p == rows) & (cols % S0p < S0)).astype(jnp.float32)       # (S1, R)

    return dict(wi_blk=wi_blk, whh_blk=whh_blk, gru_bias=gru_bias,
                watt=watt, batt=batt, bsum=bsum)


@functools.partial(jax.jit, static_argnames=("sentence_num_hidden", "target_class"))
def sent_level_rnn_pallas(x, packed, *, sentence_num_hidden, target_class):
    H = sentence_num_hidden
    C = target_class
    S0, S1, IN = x.shape
    S0p = _round_up(S0, 8)                   # 8-aligned per-timestep row blocks
    R = S1 * S0p

    # Flatten x into per-timestep row blocks (row = t*S0p + s), forward-time and
    # reversed-time, concatenated along lanes so one matmul yields both directions' gates.
    x_pad = jnp.pad(x.astype(jnp.float32), ((0, S0p - S0), (0, 0), (0, 0)))
    x_fwd = jnp.transpose(x_pad, (1, 0, 2)).reshape(R, IN)
    x_rev = jnp.transpose(x_pad[:, ::-1, :], (1, 0, 2)).reshape(R, IN)
    x_cat = jnp.concatenate([x_fwd, x_rev], axis=1)          # (R, 2*IN)

    kernel = functools.partial(sent_level_kernel, S0p=S0p, S1=S1, H=H, C=C)
    return pl.pallas_call(
        kernel,
        out_shape=jax.ShapeDtypeStruct((S1, C), jnp.float32),
        in_specs=[pl.BlockSpec(memory_space=pltpu.MemorySpace.VMEM)] * 7,
        out_specs=pl.BlockSpec(memory_space=pltpu.MemorySpace.VMEM),
        scratch_shapes=[pltpu.VMEM((R, 2 * H), jnp.float32)],
        # TODO(synk): if a batch-of-documents axis exists upstream, fold it into the
        # matmul row dimension (v5e/v6e) and add a leading "parallel" grid over documents
        # so v7x's two TensorCores each take a disjoint slice.
    )(x_cat, packed["wi_blk"], packed["whh_blk"], packed["gru_bias"],
      packed["watt"], packed["batt"], packed["bsum"])


def init_params(key, word_num_hidden, sentence_num_hidden, target_class):
    """Deterministic synthetic parameters matching the PyTorch module's shapes."""
    H = sentence_num_hidden
    IN = 2 * word_num_hidden
    D2 = 2 * H
    ks = jax.random.split(key, 13)
    kg = 1.0 / math.sqrt(H)
    kl = 1.0 / math.sqrt(D2)

    def uni(k, shape, bound):
        return jax.random.uniform(k, shape, jnp.float32, -bound, bound)

    p = {}
    # GRU params, PyTorch layout: weight_ih (3H, IN), weight_hh (3H, H), gate order r,z,n.
    # dir 0 = forward, dir 1 = reverse.
    p["w_ih"] = jnp.stack([uni(ks[0], (3 * H, IN), kg), uni(ks[1], (3 * H, IN), kg)])
    p["w_hh"] = jnp.stack([uni(ks[2], (3 * H, H), kg), uni(ks[3], (3 * H, H), kg)])
    p["b_ih"] = jnp.stack([uni(ks[4], (3 * H,), kg), uni(ks[5], (3 * H,), kg)])
    p["b_hh"] = jnp.stack([uni(ks[6], (3 * H,), kg), uni(ks[7], (3 * H,), kg)])
    # sentence_linear: Linear(2H -> 2H)
    p["lin_w"] = uni(ks[8], (D2, D2), kl)
    p["lin_b"] = uni(ks[9], (D2,), kl)
    # sentence_context_weights ~ N(0, 1/sqrt(2H)), shape (2H, 1)
    p["ctx"] = jax.random.normal(ks[10], (D2, 1), jnp.float32) * (1.0 / math.sqrt(D2))
    # fc: Linear(2H -> target_class)
    p["fc_w"] = uni(ks[11], (target_class, D2), kl)
    p["fc_b"] = uni(ks[12], (target_class,), kl)
    return p


def sent_level_rnn_ref(x, p, sentence_num_hidden):
    """Pure-JAX reference mirroring the PyTorch forward op-by-op."""
    H = sentence_num_hidden
    S0, S1, _ = x.shape

    def gru_dir(d, reverse):
        w_ih, w_hh = p["w_ih"][d], p["w_hh"][d]
        b_ih, b_hh = p["b_ih"][d], p["b_hh"][d]
        h = jnp.zeros((S0, H), jnp.float32)
        outs = [None] * S1
        order = range(S1 - 1, -1, -1) if reverse else range(S1)
        for t in order:
            xt = x[:, t, :]
            gi = xt @ w_ih.T + b_ih
            gh = h @ w_hh.T + b_hh
            r = jax.nn.sigmoid(gi[:, :H] + gh[:, :H])
            z = jax.nn.sigmoid(gi[:, H:2 * H] + gh[:, H:2 * H])
            n = jnp.tanh(gi[:, 2 * H:] + r * gh[:, 2 * H:])
            h = (1.0 - z) * n + z * h
            outs[t] = h
        return jnp.stack(outs, axis=1)  # (S0, S1, H)

    sent_h = jnp.concatenate([gru_dir(0, False), gru_dir(1, True)], axis=-1)  # (S0,S1,2H)
    u = jnp.tanh(sent_h @ p["lin_w"].T + p["lin_b"])
    sc = (u @ p["ctx"])[..., 0]                # (S0, S1)  == squeeze(dim=2)
    a = jax.nn.softmax(sc.T, axis=-1)          # (S1, S0)
    m = sent_h.transpose(2, 0, 1) * a.T        # (2H, S0, S1)
    s = jnp.sum(m, axis=1).T                   # (S1, 2H)
    return s @ p["fc_w"].T + p["fc_b"]         # (S1, C)


if __name__ == "__main__":
    word_num_hidden = 16        # GRU input = 2*word_num_hidden = 32
    sentence_num_hidden = 16    # GRU hidden H = 16, bidirectional -> 2H = 32
    target_class = 5
    S0, S1 = 4, 8               # x: (S0, S1, 2W)

    key = jax.random.PRNGKey(0)
    kx, kp = jax.random.split(key)
    x = jax.random.normal(kx, (S0, S1, 2 * word_num_hidden), jnp.float32)
    params = init_params(kp, word_num_hidden, sentence_num_hidden, target_class)

    # Pack weights (and the block-sum/pad-mask matrix) ONCE at init, outside the jit.
    packed = pack_params(params, H=sentence_num_hidden, IN=2 * word_num_hidden,
                         C=target_class, S0=S0, S1=S1)

    out = jax.block_until_ready(
        sent_level_rnn_pallas(x, packed,
                              sentence_num_hidden=sentence_num_hidden,
                              target_class=target_class))
    ref = jax.block_until_ready(
        sent_level_rnn_ref(x, params, sentence_num_hidden))

    assert out.shape == (S1, target_class), out.shape
    assert jnp.allclose(out, ref, atol=1e-4, rtol=1e-4), (out, ref)
    print("KERNEL_OK")
</pallas_src>

<mosaic_0001>
module attributes {stable_mosaic.version = 11 : i64} {
  func.func @sent_level_kernel(%arg0: memref<64x64xf32, #tpu.memory_space<vmem>>, %arg1: memref<64x96xf32, #tpu.memory_space<vmem>>, %arg2: memref<32x96xf32, #tpu.memory_space<vmem>>, %arg3: memref<2x96xf32, #tpu.memory_space<vmem>>, %arg4: memref<32x38xf32, #tpu.memory_space<vmem>>, %arg5: memref<1x37xf32, #tpu.memory_space<vmem>>, %arg6: memref<8x64xf32, #tpu.memory_space<vmem>>, %arg7: memref<8x5xf32, #tpu.memory_space<vmem>>, %arg8: memref<64x32xf32, #tpu.memory_space<vmem>>) attributes {dimension_semantics = [], scalar_prefetch = 0 : i64, scratch_operands = 1 : i64, tpu.core_type = #tpu.core_type<tc>} {
    %c0 = arith.constant 0 : index
    %c0_0 = arith.constant 0 : index
    %0 = vector.load %arg3[%c0, %c0_0] : memref<2x96xf32, #tpu.memory_space<vmem>>, vector<1x96xf32>
    %c1 = arith.constant 1 : index
    %c0_1 = arith.constant 0 : index
    %1 = vector.load %arg3[%c1, %c0_1] : memref<2x96xf32, #tpu.memory_space<vmem>>, vector<1x96xf32>
    %c0_2 = arith.constant 0 : index
    %c0_3 = arith.constant 0 : index
    %2 = vector.load %arg0[%c0_2, %c0_3] : memref<64x64xf32, #tpu.memory_space<vmem>>, vector<64x64xf32>
    %c0_4 = arith.constant 0 : index
    %c0_5 = arith.constant 0 : index
    %3 = vector.load %arg1[%c0_4, %c0_5] : memref<64x96xf32, #tpu.memory_space<vmem>>, vector<64x96xf32>
    %cst = arith.constant dense<0.000000e+00> : vector<64x96xf32>
    %4 = tpu.matmul %2, %3, %cst {dimension_numbers = #tpu.dot_dimension_numbers<[1], [0], [0], [1], [0, 0, 1, 1], [], []>} : vector<64x64xf32>, vector<64x96xf32>, vector<64x96xf32> -> vector<64x96xf32>
    %5 = vector.broadcast %0 : vector<1x96xf32> to vector<64x96xf32>
    %6 = arith.addf %4, %5 : vector<64x96xf32>
    %c0_6 = arith.constant 0 : index
    %c0_7 = arith.constant 0 : index
    %7 = vector.load %arg2[%c0_6, %c0_7] : memref<32x96xf32, #tpu.memory_space<vmem>>, vector<32x96xf32>
    %cst_8 = arith.constant 0.000000e+00 : f32
    %8 = vector.broadcast %cst_8 : f32 to vector<8x32xf32>
    %9 = vector.extract_strided_slice %6 {offsets = [0, 0], sizes = [8, 96], strides = [1, 1]} : vector<64x96xf32> to vector<8x96xf32>
    %cst_9 = arith.constant dense<0.000000e+00> : vector<8x96xf32>
    %10 = tpu.matmul %8, %7, %cst_9 {dimension_numbers = #tpu.dot_dimension_numbers<[1], [0], [0], [1], [0, 0, 1, 1], [], []>} : vector<8x32xf32>, vector<32x96xf32>, vector<8x96xf32> -> vector<8x96xf32>
    %11 = vector.broadcast %1 : vector<1x96xf32> to vector<8x96xf32>
    %12 = arith.addf %10, %11 : vector<8x96xf32>
    %13 = vector.extract_strided_slice %9 {offsets = [0, 0], sizes = [8, 64], strides = [1, 1]} : vector<8x96xf32> to vector<8x64xf32>
    %14 = vector.extract_strided_slice %12 {offsets = [0, 0], sizes = [8, 64], strides = [1, 1]} : vector<8x96xf32> to vector<8x64xf32>
    %15 = arith.addf %13, %14 : vector<8x64xf32>
    %16 = arith.negf %15 : vector<8x64xf32>
    %17 = math.exp %16 : vector<8x64xf32>
    %cst_10 = arith.constant 1.000000e+00 : f32
    %18 = vector.broadcast %cst_10 : f32 to vector<8x64xf32>
    %19 = arith.addf %18, %17 : vector<8x64xf32>
    %20 = arith.divf %18, %19 : vector<8x64xf32>
    %21 = vector.extract_strided_slice %20 {offsets = [0, 0], sizes = [8, 32], strides = [1, 1]} : vector<8x64xf32> to vector<8x32xf32>
    %22 = vector.extract_strided_slice %20 {offsets = [0, 32], sizes = [8, 32], strides = [1, 1]} : vector<8x64xf32> to vector<8x32xf32>
    %23 = vector.extract_strided_slice %9 {offsets = [0, 64], sizes = [8, 32], strides = [1, 1]} : vector<8x96xf32> to vector<8x32xf32>
    %24 = vector.extract_strided_slice %12 {offsets = [0, 64], sizes = [8, 32], strides = [1, 1]} : vector<8x96xf32> to vector<8x32xf32>
    %25 = arith.mulf %21, %24 : vector<8x32xf32>
    %26 = arith.addf %23, %25 : vector<8x32xf32>
    %27 = math.tanh %26 : vector<8x32xf32>
    %cst_11 = arith.constant 1.000000e+00 : f32
    %28 = vector.broadcast %cst_11 : f32 to vector<8x32xf32>
    %29 = arith.subf %28, %22 : vector<8x32xf32>
    %30 = arith.mulf %29, %27 : vector<8x32xf32>
    %31 = arith.mulf %22, %8 : vector<8x32xf32>
    %32 = arith.addf %30, %31 : vector<8x32xf32>
    %33 = vector.extract_strided_slice %32 {offsets = [0, 0], sizes = [8, 16], strides = [1, 1]} : vector<8x32xf32> to vector<8x16xf32>
    %c0_12 = arith.constant 0 : index
    %c0_13 = arith.constant 0 : index
    %34 = vector.load %arg8[%c0_12, %c0_13] : memref<64x32xf32, #tpu.memory_space<vmem>>, vector<8x16xf32>
    tpu.vector_store %arg8[%c0_12, %c0_13], %33 {strides = array<i32>} : memref<64x32xf32, #tpu.memory_space<vmem>>, vector<8x16xf32>,
    %35 = vector.extract_strided_slice %32 {offsets = [0, 16], sizes = [8, 16], strides = [1, 1]} : vector<8x32xf32> to vector<8x16xf32>
    %c56 = arith.constant 56 : index
    %c16 = arith.constant 16 : index
    %36 = vector.load %arg8[%c56, %c16] : memref<64x32xf32, #tpu.memory_space<vmem>>, vector<8x16xf32>
    tpu.vector_store %arg8[%c56, %c16], %35 {strides = array<i32>} : memref<64x32xf32, #tpu.memory_space<vmem>>, vector<8x16xf32>,
    %37 = vector.extract_strided_slice %6 {offsets = [8, 0], sizes = [8, 96], strides = [1, 1]} : vector<64x96xf32> to vector<8x96xf32>
    %cst_14 = arith.constant dense<0.000000e+00> : vector<8x96xf32>
    %38 = tpu.matmul %32, %7, %cst_14 {dimension_numbers = #tpu.dot_dimension_numbers<[1], [0], [0], [1], [0, 0, 1, 1], [], []>} : vector<8x32xf32>, vector<32x96xf32>, vector<8x96xf32> -> vector<8x96xf32>
    %39 = vector.broadcast %1 : vector<1x96xf32> to vector<8x96xf32>
    %40 = arith.addf %38, %39 : vector<8x96xf32>
    %41 = vector.extract_strided_slice %37 {offsets = [0, 0], sizes = [8, 64], strides = [1, 1]} : vector<8x96xf32> to vector<8x64xf32>
    %42 = vector.extract_strided_slice %40 {offsets = [0, 0], sizes = [8, 64], strides = [1, 1]} : vector<8x96xf32> to vector<8x64xf32>
    %43 = arith.addf %41, %42 : vector<8x64xf32>
    %44 = arith.negf %43 : vector<8x64xf32>
    %45 = math.exp %44 : vector<8x64xf32>
    %cst_15 = arith.constant 1.000000e+00 : f32
    %46 = vector.broadcast %cst_15 : f32 to vector<8x64xf32>
    %47 = arith.addf %46, %45 : vector<8x64xf32>
    %48 = arith.divf %46, %47 : vector<8x64xf32>
    %49 = vector.extract_strided_slice %48 {offsets = [0, 0], sizes = [8, 32], strides = [1, 1]} : vector<8x64xf32> to vector<8x32xf32>
    %50 = vector.extract_strided_slice %48 {offsets = [0, 32], sizes = [8, 32], strides = [1, 1]} : vector<8x64xf32> to vector<8x32xf32>
    %51 = vector.extract_strided_slice %37 {offsets = [0, 64], sizes = [8, 32], strides = [1, 1]} : vector<8x96xf32> to vector<8x32xf32>
    %52 = vector.extract_strided_slice %40 {offsets = [0, 64], sizes = [8, 32], strides = [1, 1]} : vector<8x96xf32> to vector<8x32xf32>
    %53 = arith.mulf %49, %52 : vector<8x32xf32>
    %54 = arith.addf %51, %53 : vector<8x32xf32>
    %55 = math.tanh %54 : vector<8x32xf32>
    %cst_16 = arith.constant 1.000000e+00 : f32
    %56 = vector.broadcast %cst_16 : f32 to vector<8x32xf32>
    %57 = arith.subf %56, %50 : vector<8x32xf32>
    %58 = arith.mulf %57, %55 : vector<8x32xf32>
    %59 = arith.mulf %50, %32 : vector<8x32xf32>
    %60 = arith.addf %58, %59 : vector<8x32xf32>
    %61 = vector.extract_strided_slice %60 {offsets = [0, 0], sizes = [8, 16], strides = [1, 1]} : vector<8x32xf32> to vector<8x16xf32>
    %c8 = arith.constant 8 : index
    %c0_17 = arith.constant 0 : index
    %62 = vector.load %arg8[%c8, %c0_17] : memref<64x32xf32, #tpu.memory_space<vmem>>, vector<8x16xf32>
    tpu.vector_store %arg8[%c8, %c0_17], %61 {strides = array<i32>} : memref<64x32xf32, #tpu.memory_space<vmem>>, vector<8x16xf32>,
    %63 = vector.extract_strided_slice %60 {offsets = [0, 16], sizes = [8, 16], strides = [1, 1]} : vector<8x32xf32> to vector<8x16xf32>
    %c48 = arith.constant 48 : index
    %c16_18 = arith.constant 16 : index
    %64 = vector.load %arg8[%c48, %c16_18] : memref<64x32xf32, #tpu.memory_space<vmem>>, vector<8x16xf32>
    tpu.vector_store %arg8[%c48, %c16_18], %63 {strides = array<i32>} : memref<64x32xf32, #tpu.memory_space<vmem>>, vector<8x16xf32>,
    %65 = vector.extract_strided_slice %6 {offsets = [16, 0], sizes = [8, 96], strides = [1, 1]} : vector<64x96xf32> to vector<8x96xf32>
    %cst_19 = arith.constant dense<0.000000e+00> : vector<8x96xf32>
    %66 = tpu.matmul %60, %7, %cst_19 {dimension_numbers = #tpu.dot_dimension_numbers<[1], [0], [0], [1], [0, 0, 1, 1], [], []>} : vector<8x32xf32>, vector<32x96xf32>, vector<8x96xf32> -> vector<8x96xf32>
    %67 = vector.broadcast %1 : vector<1x96xf32> to vector<8x96xf32>
    %68 = arith.addf %66, %67 : vector<8x96xf32>
    %69 = vector.extract_strided_slice %65 {offsets = [0, 0], sizes = [8, 64], strides = [1, 1]} : vector<8x96xf32> to vector<8x64xf32>
    %70 = vector.extract_strided_slice %68 {offsets = [0, 0], sizes = [8, 64], strides = [1, 1]} : vector<8x96xf32> to vector<8x64xf32>
    %71 = arith.addf %69, %70 : vector<8x64xf32>
    %72 = arith.negf %71 : vector<8x64xf32>
    %73 = math.exp %72 : vector<8x64xf32>
    %cst_20 = arith.constant 1.000000e+00 : f32
    %74 = vector.broadcast %cst_20 : f32 to vector<8x64xf32>
    %75 = arith.addf %74, %73 : vector<8x64xf32>
    %76 = arith.divf %74, %75 : vector<8x64xf32>
    %77 = vector.extract_strided_slice %76 {offsets = [0, 0], sizes = [8, 32], strides = [1, 1]} : vector<8x64xf32> to vector<8x32xf32>
    %78 = vector.extract_strided_slice %76 {offsets = [0, 32], sizes = [8, 32], strides = [1, 1]} : vector<8x64xf32> to vector<8x32xf32>
    %79 = vector.extract_strided_slice %65 {offsets = [0, 64], sizes = [8, 32], strides = [1, 1]} : vector<8x96xf32> to vector<8x32xf32>
    %80 = vector.extract_strided_slice %68 {offsets = [0, 64], sizes = [8, 32], strides = [1, 1]} : vector<8x96xf32> to vector<8x32xf32>
    %81 = arith.mulf %77, %80 : vector<8x32xf32>
    %82 = arith.addf %79, %81 : vector<8x32xf32>
    %83 = math.tanh %82 : vector<8x32xf32>
    %cst_21 = arith.constant 1.000000e+00 : f32
    %84 = vector.broadcast %cst_21 : f32 to vector<8x32xf32>
    %85 = arith.subf %84, %78 : vector<8x32xf32>
    %86 = arith.mulf %85, %83 : vector<8x32xf32>
    %87 = arith.mulf %78, %60 : vector<8x32xf32>
    %88 = arith.addf %86, %87 : vector<8x32xf32>
    %89 = vector.extract_strided_slice %88 {offsets = [0, 0], sizes = [8, 16], strides = [1, 1]} : vector<8x32xf32> to vector<8x16xf32>
    %c16_22 = arith.constant 16 : index
    %c0_23 = arith.constant 0 : index
    %90 = vector.load %arg8[%c16_22, %c0_23] : memref<64x32xf32, #tpu.memory_space<vmem>>, vector<8x16xf32>
    tpu.vector_store %arg8[%c16_22, %c0_23], %89 {strides = array<i32>} : memref<64x32xf32, #tpu.memory_space<vmem>>, vector<8x16xf32>,
    %91 = vector.extract_strided_slice %88 {offsets = [0, 16], sizes = [8, 16], strides = [1, 1]} : vector<8x32xf32> to vector<8x16xf32>
    %c40 = arith.constant 40 : index
    %c16_24 = arith.constant 16 : index
    %92 = vector.load %arg8[%c40, %c16_24] : memref<64x32xf32, #tpu.memory_space<vmem>>, vector<8x16xf32>
    tpu.vector_store %arg8[%c40, %c16_24], %91 {strides = array<i32>} : memref<64x32xf32, #tpu.memory_space<vmem>>, vector<8x16xf32>,
    %93 = vector.extract_strided_slice %6 {offsets = [24, 0], sizes = [8, 96], strides = [1, 1]} : vector<64x96xf32> to vector<8x96xf32>
    %cst_25 = arith.constant dense<0.000000e+00> : vector<8x96xf32>
    %94 = tpu.matmul %88, %7, %cst_25 {dimension_numbers = #tpu.dot_dimension_numbers<[1], [0], [0], [1], [0, 0, 1, 1], [], []>} : vector<8x32xf32>, vector<32x96xf32>, vector<8x96xf32> -> vector<8x96xf32>
    %95 = vector.broadcast %1 : vector<1x96xf32> to vector<8x96xf32>
    %96 = arith.addf %94, %95 : vector<8x96xf32>
    %97 = vector.extract_strided_slice %93 {offsets = [0, 0], sizes = [8, 64], strides = [1, 1]} : vector<8x96xf32> to vector<8x64xf32>
    %98 = vector.extract_strided_slice %96 {offsets = [0, 0], sizes = [8, 64], strides = [1, 1]} : vector<8x96xf32> to vector<8x64xf32>
    %99 = arith.addf %97, %98 : vector<8x64xf32>
    %100 = arith.negf %99 : vector<8x64xf32>
    %101 = math.exp %100 : vector<8x64xf32>
    %cst_26 = arith.constant 1.000000e+00 : f32
    %102 = vector.broadcast %cst_26 : f32 to vector<8x64xf32>
    %103 = arith.addf %102, %101 : vector<8x64xf32>
    %104 = arith.divf %102, %103 : vector<8x64xf32>
    %105 = vector.extract_strided_slice %104 {offsets = [0, 0], sizes = [8, 32], strides = [1, 1]} : vector<8x64xf32> to vector<8x32xf32>
    %106 = vector.extract_strided_slice %104 {offsets = [0, 32], sizes = [8, 32], strides = [1, 1]} : vector<8x64xf32> to vector<8x32xf32>
    %107 = vector.extract_strided_slice %93 {offsets = [0, 64], sizes = [8, 32], strides = [1, 1]} : vector<8x96xf32> to vector<8x32xf32>
    %108 = vector.extract_strided_slice %96 {offsets = [0, 64], sizes = [8, 32], strides = [1, 1]} : vector<8x96xf32> to vector<8x32xf32>
    %109 = arith.mulf %105, %108 : vector<8x32xf32>
    %110 = arith.addf %107, %109 : vector<8x32xf32>
    %111 = math.tanh %110 : vector<8x32xf32>
    %cst_27 = arith.constant 1.000000e+00 : f32
    %112 = vector.broadcast %cst_27 : f32 to vector<8x32xf32>
    %113 = arith.subf %112, %106 : vector<8x32xf32>
    %114 = arith.mulf %113, %111 : vector<8x32xf32>
    %115 = arith.mulf %106, %88 : vector<8x32xf32>
    %116 = arith.addf %114, %115 : vector<8x32xf32>
    %117 = vector.extract_strided_slice %116 {offsets = [0, 0], sizes = [8, 16], strides = [1, 1]} : vector<8x32xf32> to vector<8x16xf32>
    %c24 = arith.constant 24 : index
    %c0_28 = arith.constant 0 : index
    %118 = vector.load %arg8[%c24, %c0_28] : memref<64x32xf32, #tpu.memory_space<vmem>>, vector<8x16xf32>
    tpu.vector_store %arg8[%c24, %c0_28], %117 {strides = array<i32>} : memref<64x32xf32, #tpu.memory_space<vmem>>, vector<8x16xf32>,
    %119 = vector.extract_strided_slice %116 {offsets = [0, 16], sizes = [8, 16], strides = [1, 1]} : vector<8x32xf32> to vector<8x16xf32>
    %c32 = arith.constant 32 : index
    %c16_29 = arith.constant 16 : index
    %120 = vector.load %arg8[%c32, %c16_29] : memref<64x32xf32, #tpu.memory_space<vmem>>, vector<8x16xf32>
    tpu.vector_store %arg8[%c32, %c16_29], %119 {strides = array<i32>} : memref<64x32xf32, #tpu.memory_space<vmem>>, vector<8x16xf32>,
    %121 = vector.extract_strided_slice %6 {offsets = [32, 0], sizes = [8, 96], strides = [1, 1]} : vector<64x96xf32> to vector<8x96xf32>
    %cst_30 = arith.constant dense<0.000000e+00> : vector<8x96xf32>
    %122 = tpu.matmul %116, %7, %cst_30 {dimension_numbers = #tpu.dot_dimension_numbers<[1], [0], [0], [1], [0, 0, 1, 1], [], []>} : vector<8x32xf32>, vector<32x96xf32>, vector<8x96xf32> -> vector<8x96xf32>
    %123 = vector.broadcast %1 : vector<1x96xf32> to vector<8x96xf32>
    %124 = arith.addf %122, %123 : vector<8x96xf32>
    %125 = vector.extract_strided_slice %121 {offsets = [0, 0], sizes = [8, 64], strides = [1, 1]} : vector<8x96xf32> to vector<8x64xf32>
    %126 = vector.extract_strided_slice %124 {offsets = [0, 0], sizes = [8, 64], strides = [1, 1]} : vector<8x96xf32> to vector<8x64xf32>
    %127 = arith.addf %125, %126 : vector<8x64xf32>
    %128 = arith.negf %127 : vector<8x64xf32>
    %129 = math.exp %128 : vector<8x64xf32>
    %cst_31 = arith.constant 1.000000e+00 : f32
    %130 = vector.broadcast %cst_31 : f32 to vector<8x64xf32>
    %131 = arith.addf %130, %129 : vector<8x64xf32>
    %132 = arith.divf %130, %131 : vector<8x64xf32>
    %133 = vector.extract_strided_slice %132 {offsets = [0, 0], sizes = [8, 32], strides = [1, 1]} : vector<8x64xf32> to vector<8x32xf32>
    %134 = vector.extract_strided_slice %132 {offsets = [0, 32], sizes = [8, 32], strides = [1, 1]} : vector<8x64xf32> to vector<8x32xf32>
    %135 = vector.extract_strided_slice %121 {offsets = [0, 64], sizes = [8, 32], strides = [1, 1]} : vector<8x96xf32> to vector<8x32xf32>
    %136 = vector.extract_strided_slice %124 {offsets = [0, 64], sizes = [8, 32], strides = [1, 1]} : vector<8x96xf32> to vector<8x32xf32>
    %137 = arith.mulf %133, %136 : vector<8x32xf32>
    %138 = arith.addf %135, %137 : vector<8x32xf32>
    %139 = math.tanh %138 : vector<8x32xf32>
    %cst_32 = arith.constant 1.000000e+00 : f32
    %140 = vector.broadcast %cst_32 : f32 to vector<8x32xf32>
    %141 = arith.subf %140, %134 : vector<8x32xf32>
    %142 = arith.mulf %141, %139 : vector<8x32xf32>
    %143 = arith.mulf %134, %116 : vector<8x32xf32>
    %144 = arith.addf %142, %143 : vector<8x32xf32>
    %145 = vector.extract_strided_slice %144 {offsets = [0, 0], sizes = [8, 16], strides = [1, 1]} : vector<8x32xf32> to vector<8x16xf32>
    %c32_33 = arith.constant 32 : index
    %c0_34 = arith.constant 0 : index
    %146 = vector.load %arg8[%c32_33, %c0_34] : memref<64x32xf32, #tpu.memory_space<vmem>>, vector<8x16xf32>
    tpu.vector_store %arg8[%c32_33, %c0_34], %145 {strides = array<i32>} : memref<64x32xf32, #tpu.memory_space<vmem>>, vector<8x16xf32>,
    %147 = vector.extract_strided_slice %144 {offsets = [0, 16], sizes = [8, 16], strides = [1, 1]} : vector<8x32xf32> to vector<8x16xf32>
    %c24_35 = arith.constant 24 : index
    %c16_36 = arith.constant 16 : index
    %148 = vector.load %arg8[%c24_35, %c16_36] : memref<64x32xf32, #tpu.memory_space<vmem>>, vector<8x16xf32>
    tpu.vector_store %arg8[%c24_35, %c16_36], %147 {strides = array<i32>} : memref<64x32xf32, #tpu.memory_space<vmem>>, vector<8x16xf32>,
    %149 = vector.extract_strided_slice %6 {offsets = [40, 0], sizes = [8, 96], strides = [1, 1]} : vector<64x96xf32> to vector<8x96xf32>
    %cst_37 = arith.constant dense<0.000000e+00> : vector<8x96xf32>
    %150 = tpu.matmul %144, %7, %cst_37 {dimension_numbers = #tpu.dot_dimension_numbers<[1], [0], [0], [1], [0, 0, 1, 1], [], []>} : vector<8x32xf32>, vector<32x96xf32>, vector<8x96xf32> -> vector<8x96xf32>
    %151 = vector.broadcast %1 : vector<1x96xf32> to vector<8x96xf32>
    %152 = arith.addf %150, %151 : vector<8x96xf32>
    %153 = vector.extract_strided_slice %149 {offsets = [0, 0], sizes = [8, 64], strides = [1, 1]} : vector<8x96xf32> to vector<8x64xf32>
    %154 = vector.extract_strided_slice %152 {offsets = [0, 0], sizes = [8, 64], strides = [1, 1]} : vector<8x96xf32> to vector<8x64xf32>
    %155 = arith.addf %153, %154 : vector<8x64xf32>
    %156 = arith.negf %155 : vector<8x64xf32>
    %157 = math.exp %156 : vector<8x64xf32>
    %cst_38 = arith.constant 1.000000e+00 : f32
    %158 = vector.broadcast %cst_38 : f32 to vector<8x64xf32>
    %159 = arith.addf %158, %157 : vector<8x64xf32>
    %160 = arith.divf %158, %159 : vector<8x64xf32>
    %161 = vector.extract_strided_slice %160 {offsets = [0, 0], sizes = [8, 32], strides = [1, 1]} : vector<8x64xf32> to vector<8x32xf32>
    %162 = vector.extract_strided_slice %160 {offsets = [0, 32], sizes = [8, 32], strides = [1, 1]} : vector<8x64xf32> to vector<8x32xf32>
    %163 = vector.extract_strided_slice %149 {offsets = [0, 64], sizes = [8, 32], strides = [1, 1]} : vector<8x96xf32> to vector<8x32xf32>
    %164 = vector.extract_strided_slice %152 {offsets = [0, 64], sizes = [8, 32], strides = [1, 1]} : vector<8x96xf32> to vector<8x32xf32>
    %165 = arith.mulf %161, %164 : vector<8x32xf32>
    %166 = arith.addf %163, %165 : vector<8x32xf32>
    %167 = math.tanh %166 : vector<8x32xf32>
    %cst_39 = arith.constant 1.000000e+00 : f32
    %168 = vector.broadcast %cst_39 : f32 to vector<8x32xf32>
    %169 = arith.subf %168, %162 : vector<8x32xf32>
    %170 = arith.mulf %169, %167 : vector<8x32xf32>
    %171 = arith.mulf %162, %144 : vector<8x32xf32>
    %172 = arith.addf %170, %171 : vector<8x32xf32>
    %173 = vector.extract_strided_slice %172 {offsets = [0, 0], sizes = [8, 16], strides = [1, 1]} : vector<8x32xf32> to vector<8x16xf32>
    %c40_40 = arith.constant 40 : index
    %c0_41 = arith.constant 0 : index
    %174 = vector.load %arg8[%c40_40, %c0_41] : memref<64x32xf32, #tpu.memory_space<vmem>>, vector<8x16xf32>
    tpu.vector_store %arg8[%c40_40, %c0_41], %173 {strides = array<i32>} : memref<64x32xf32, #tpu.memory_space<vmem>>, vector<8x16xf32>,
    %175 = vector.extract_strided_slice %172 {offsets = [0, 16], sizes = [8, 16], strides = [1, 1]} : vector<8x32xf32> to vector<8x16xf32>
    %c16_42 = arith.constant 16 : index
    %c16_43 = arith.constant 16 : index
    %176 = vector.load %arg8[%c16_42, %c16_43] : memref<64x32xf32, #tpu.memory_space<vmem>>, vector<8x16xf32>
    tpu.vector_store %arg8[%c16_42, %c16_43], %175 {strides = array<i32>} : memref<64x32xf32, #tpu.memory_space<vmem>>, vector<8x16xf32>,
    %177 = vector.extract_strided_slice %6 {offsets = [48, 0], sizes = [8, 96], strides = [1, 1]} : vector<64x96xf32> to vector<8x96xf32>
    %cst_44 = arith.constant dense<0.000000e+00> : vector<8x96xf32>
    %178 = tpu.matmul %172, %7, %cst_44 {dimension_numbers = #tpu.dot_dimension_numbers<[1], [0], [0], [1], [0, 0, 1, 1], [], []>} : vector<8x32xf32>, vector<32x96xf32>, vector<8x96xf32> -> vector<8x96xf32>
    %179 = vector.broadcast %1 : vector<1x96xf32> to vector<8x96xf32>
    %180 = arith.addf %178, %179 : vector<8x96xf32>
    %181 = vector.extract_strided_slice %177 {offsets = [0, 0], sizes = [8, 64], strides = [1, 1]} : vector<8x96xf32> to vector<8x64xf32>
    %182 = vector.extract_strided_slice %180 {offsets = [0, 0], sizes = [8, 64], strides = [1, 1]} : vector<8x96xf32> to vector<8x64xf32>
    %183 = arith.addf %181, %182 : vector<8x64xf32>
    %184 = arith.negf %183 : vector<8x64xf32>
    %185 = math.exp %184 : vector<8x64xf32>
    %cst_45 = arith.constant 1.000000e+00 : f32
    %186 = vector.broadcast %cst_45 : f32 to vector<8x64xf32>
    %187 = arith.addf %186, %185 : vector<8x64xf32>
    %188 = arith.divf %186, %187 : vector<8x64xf32>
    %189 = vector.extract_strided_slice %188 {offsets = [0, 0], sizes = [8, 32], strides = [1, 1]} : vector<8x64xf32> to vector<8x32xf32>
    %190 = vector.extract_strided_slice %188 {offsets = [0, 32], sizes = [8, 32], strides = [1, 1]} : vector<8x64xf32> to vector<8x32xf32>
    %191 = vector.extract_strided_slice %177 {offsets = [0, 64], sizes = [8, 32], strides = [1, 1]} : vector<8x96xf32> to vector<8x32xf32>
    %192 = vector.extract_strided_slice %180 {offsets = [0, 64], sizes = [8, 32], strides = [1, 1]} : vector<8x96xf32> to vector<8x32xf32>
    %193 = arith.mulf %189, %192 : vector<8x32xf32>
    %194 = arith.addf %191, %193 : vector<8x32xf32>
    %195 = math.tanh %194 : vector<8x32xf32>
    %cst_46 = arith.constant 1.000000e+00 : f32
    %196 = vector.broadcast %cst_46 : f32 to vector<8x32xf32>
    %197 = arith.subf %196, %190 : vector<8x32xf32>
    %198 = arith.mulf %197, %195 : vector<8x32xf32>
    %199 = arith.mulf %190, %172 : vector<8x32xf32>
    %200 = arith.addf %198, %199 : vector<8x32xf32>
    %201 = vector.extract_strided_slice %200 {offsets = [0, 0], sizes = [8, 16], strides = [1, 1]} : vector<8x32xf32> to vector<8x16xf32>
    %c48_47 = arith.constant 48 : index
    %c0_48 = arith.constant 0 : index
    %202 = vector.load %arg8[%c48_47, %c0_48] : memref<64x32xf32, #tpu.memory_space<vmem>>, vector<8x16xf32>
    tpu.vector_store %arg8[%c48_47, %c0_48], %201 {strides = array<i32>} : memref<64x32xf32, #tpu.memory_space<vmem>>, vector<8x16xf32>,
    %203 = vector.extract_strided_slice %200 {offsets = [0, 16], sizes = [8, 16], strides = [1, 1]} : vector<8x32xf32> to vector<8x16xf32>
    %c8_49 = arith.constant 8 : index
    %c16_50 = arith.constant 16 : index
    %204 = vector.load %arg8[%c8_49, %c16_50] : memref<64x32xf32, #tpu.memory_space<vmem>>, vector<8x16xf32>
    tpu.vector_store %arg8[%c8_49, %c16_50], %203 {strides = array<i32>} : memref<64x32xf32, #tpu.memory_space<vmem>>, vector<8x16xf32>,
    %205 = vector.extract_strided_slice %6 {offsets = [56, 0], sizes = [8, 96], strides = [1, 1]} : vector<64x96xf32> to vector<8x96xf32>
    %cst_51 = arith.constant dense<0.000000e+00> : vector<8x96xf32>
    %206 = tpu.matmul %200, %7, %cst_51 {dimension_numbers = #tpu.dot_dimension_numbers<[1], [0], [0], [1], [0, 0, 1, 1], [], []>} : vector<8x32xf32>, vector<32x96xf32>, vector<8x96xf32> -> vector<8x96xf32>
    %207 = vector.broadcast %1 : vector<1x96xf32> to vector<8x96xf32>
    %208 = arith.addf %206, %207 : vector<8x96xf32>
    %209 = vector.extract_strided_slice %205 {offsets = [0, 0], sizes = [8, 64], strides = [1, 1]} : vector<8x96xf32> to vector<8x64xf32>
    %210 = vector.extract_strided_slice %208 {offsets = [0, 0], sizes = [8, 64], strides = [1, 1]} : vector<8x96xf32> to vector<8x64xf32>
    %211 = arith.addf %209, %210 : vector<8x64xf32>
    %212 = arith.negf %211 : vector<8x64xf32>
    %213 = math.exp %212 : vector<8x64xf32>
    %cst_52 = arith.constant 1.000000e+00 : f32
    %214 = vector.broadcast %cst_52 : f32 to vector<8x64xf32>
    %215 = arith.addf %214, %213 : vector<8x64xf32>
    %216 = arith.divf %214, %215 : vector<8x64xf32>
    %217 = vector.extract_strided_slice %216 {offsets = [0, 0], sizes = [8, 32], strides = [1, 1]} : vector<8x64xf32> to vector<8x32xf32>
    %218 = vector.extract_strided_slice %216 {offsets = [0, 32], sizes = [8, 32], strides = [1, 1]} : vector<8x64xf32> to vector<8x32xf32>
    %219 = vector.extract_strided_slice %205 {offsets = [0, 64], sizes = [8, 32], strides = [1, 1]} : vector<8x96xf32> to vector<8x32xf32>
    %220 = vector.extract_strided_slice %208 {offsets = [0, 64], sizes = [8, 32], strides = [1, 1]} : vector<8x96xf32> to vector<8x32xf32>
    %221 = arith.mulf %217, %220 : vector<8x32xf32>
    %222 = arith.addf %219, %221 : vector<8x32xf32>
    %223 = math.tanh %222 : vector<8x32xf32>
    %cst_53 = arith.constant 1.000000e+00 : f32
    %224 = vector.broadcast %cst_53 : f32 to vector<8x32xf32>
    %225 = arith.subf %224, %218 : vector<8x32xf32>
    %226 = arith.mulf %225, %223 : vector<8x32xf32>
    %227 = arith.mulf %218, %200 : vector<8x32xf32>
    %228 = arith.addf %226, %227 : vector<8x32xf32>
    %229 = vector.extract_strided_slice %228 {offsets = [0, 0], sizes = [8, 16], strides = [1, 1]} : vector<8x32xf32> to vector<8x16xf32>
    %c56_54 = arith.constant 56 : index
    %c0_55 = arith.constant 0 : index
    %230 = vector.load %arg8[%c56_54, %c0_55] : memref<64x32xf32, #tpu.memory_space<vmem>>, vector<8x16xf32>
    tpu.vector_store %arg8[%c56_54, %c0_55], %229 {strides = array<i32>} : memref<64x32xf32, #tpu.memory_space<vmem>>, vector<8x16xf32>,
    %231 = vector.extract_strided_slice %228 {offsets = [0, 16], sizes = [8, 16], strides = [1, 1]} : vector<8x32xf32> to vector<8x16xf32>
    %c0_56 = arith.constant 0 : index
    %c16_57 = arith.constant 16 : index
    %232 = vector.load %arg8[%c0_56, %c16_57] : memref<64x32xf32, #tpu.memory_space<vmem>>, vector<8x16xf32>
    tpu.vector_store %arg8[%c0_56, %c16_57], %231 {strides = array<i32>} : memref<64x32xf32, #tpu.memory_space<vmem>>, vector<8x16xf32>,
    %c0_58 = arith.constant 0 : index
    %c0_59 = arith.constant 0 : index
    %233 = vector.load %arg8[%c0_58, %c0_59] : memref<64x32xf32, #tpu.memory_space<vmem>>, vector<64x32xf32>
    %c0_60 = arith.constant 0 : index
    %c0_61 = arith.constant 0 : index
    %234 = vector.load %arg4[%c0_60, %c0_61] : memref<32x38xf32, #tpu.memory_space<vmem>>, vector<32x32xf32>
    %c0_62 = arith.constant 0 : index
    %c32_63 = arith.constant 32 : index
    %235 = vector.load %arg4[%c0_62, %c32_63] : memref<32x38xf32, #tpu.memory_space<vmem>>, vector<32x1xf32>
    %c0_64 = arith.constant 0 : index
    %c33 = arith.constant 33 : index
    %236 = vector.load %arg4[%c0_64, %c33] : memref<32x38xf32, #tpu.memory_space<vmem>>, vector<32x5xf32>
    %c0_65 = arith.constant 0 : index
    %c0_66 = arith.constant 0 : index
    %237 = vector.load %arg5[%c0_65, %c0_66] : memref<1x37xf32, #tpu.memory_space<vmem>>, vector<1x32xf32>
    %c0_67 = arith.constant 0 : index
    %c32_68 = arith.constant 32 : index
    %238 = vector.load %arg5[%c0_67, %c32_68] : memref<1x37xf32, #tpu.memory_space<vmem>>, vector<1x5xf32>
    %cst_69 = arith.constant dense<0.000000e+00> : vector<64x32xf32>
    %239 = tpu.matmul %233, %234, %cst_69 {dimension_numbers = #tpu.dot_dimension_numbers<[1], [0], [0], [1], [0, 0, 1, 1], [], []>} : vector<64x32xf32>, vector<32x32xf32>, vector<64x32xf32> -> vector<64x32xf32>
    %240 = vector.broadcast %237 : vector<1x32xf32> to vector<64x32xf32>
    %241 = arith.addf %239, %240 : vector<64x32xf32>
    %242 = math.tanh %241 : vector<64x32xf32>
    %cst_70 = arith.constant dense<0.000000e+00> : vector<64x1xf32>
    %243 = tpu.matmul %242, %235, %cst_70 {dimension_numbers = #tpu.dot_dimension_numbers<[1], [0], [0], [1], [0, 0, 1, 1], [], []>} : vector<64x32xf32>, vector<32x1xf32>, vector<64x1xf32> -> vector<64x1xf32>
    %cst_71 = arith.constant dense<0xFF800000> : vector<1xf32>
    %244 = vector.multi_reduction <maximumf>, %243, %cst_71 [0] : vector<64x1xf32> to vector<1xf32>
    %245 = vector.shape_cast %244 : vector<1xf32> to vector<1x1xf32>
    %246 = vector.broadcast %245 : vector<1x1xf32> to vector<64x1xf32>
    %247 = arith.subf %243, %246 : vector<64x1xf32>
    %248 = math.exp %247 : vector<64x1xf32>
    %c0_72 = arith.constant 0 : index
    %c0_73 = arith.constant 0 : index
    %249 = vector.load %arg6[%c0_72, %c0_73] : memref<8x64xf32, #tpu.memory_space<vmem>>, vector<8x64xf32>
    %250 = vector.broadcast %248 : vector<64x1xf32> to vector<64x32xf32>
    %251 = arith.mulf %233, %250 : vector<64x32xf32>
    %252 = tpu.concatenate %248, %251 in 1 : vector<64x1xf32>, vector<64x32xf32> -> vector<64x33xf32>
    %cst_74 = arith.constant dense<0.000000e+00> : vector<8x33xf32>
    %253 = tpu.matmul %249, %252, %cst_74 {dimension_numbers = #tpu.dot_dimension_numbers<[1], [0], [0], [1], [0, 0, 1, 1], [], []>} : vector<8x64xf32>, vector<64x33xf32>, vector<8x33xf32> -> vector<8x33xf32>
    %254 = vector.extract_strided_slice %253 {offsets = [0, 0], sizes = [8, 1], strides = [1, 1]} : vector<8x33xf32> to vector<8x1xf32>
    %cst_75 = arith.constant 1.000000e+00 : f32
    %255 = vector.broadcast %cst_75 : f32 to vector<8x1xf32>
    %256 = arith.divf %255, %254 : vector<8x1xf32>
    %257 = vector.extract_strided_slice %253 {offsets = [0, 1], sizes = [8, 32], strides = [1, 1]} : vector<8x33xf32> to vector<8x32xf32>
    %258 = vector.broadcast %256 : vector<8x1xf32> to vector<8x32xf32>
    %259 = arith.mulf %257, %258 : vector<8x32xf32>
    %cst_76 = arith.constant dense<0.000000e+00> : vector<8x5xf32>
    %260 = tpu.matmul %259, %236, %cst_76 {dimension_numbers = #tpu.dot_dimension_numbers<[1], [0], [0], [1], [0, 0, 1, 1], [], []>} : vector<8x32xf32>, vector<32x5xf32>, vector<8x5xf32> -> vector<8x5xf32>
    %261 = vector.broadcast %238 : vector<1x5xf32> to vector<8x5xf32>
    %262 = arith.addf %260, %261 : vector<8x5xf32>
    %c0_77 = arith.constant 0 : index
    %c0_78 = arith.constant 0 : index
    %263 = vector.load %arg7[%c0_77, %c0_78] : memref<8x5xf32, #tpu.memory_space<vmem>>, vector<8x5xf32>
    tpu.vector_store %arg7[%c0_77, %c0_78], %262 {strides = array<i32>} : memref<8x5xf32, #tpu.memory_space<vmem>>, vector<8x5xf32>,
    return
  }
}

</mosaic_0001>

<bundles_post_ra>
// kernel: sent_level_rnn_pallas.1
= control target key start
LH: loop header
LB: loop body
LE: loop exit
PB: predicated region body
PF: predicated region fallthrough
CT: control target
= control target key end

     0   :  { %s1617_s0 = inlined_call_operand.vmem [shape: f32[64,64], index: 0, kind: input, shape index: {}]   ;;  %s1618_s1 = inlined_call_operand.vmem [shape: f32[64,96], index: 1, kind: input, shape index: {}]   ;;  %s1619_s2 = inlined_call_operand.vmem [shape: f32[32,96], index: 2, kind: input, shape index: {}]   ;;  %s1620_s3 = inlined_call_operand.vmem [shape: f32[2,96], index: 3, kind: input, shape index: {}]   ;;  %s1621_s4 = inlined_call_operand.vmem [shape: f32[32,38], index: 4, kind: input, shape index: {}]   ;;  %s1622_s5 = inlined_call_operand.vmem [shape: f32[1,37], index: 5, kind: input, shape index: {}]   ;;  %s1623_s6 = inlined_call_operand.vmem [shape: f32[8,64], index: 6, kind: input, shape index: {}]   ;;  %s1624_s7 = inlined_call_operand.hbm [shape: f32[8,5], index: 7, kind: output, shape index: {}]  }
   0x1   :  { %v44_v0 = vld [vmem:[%s1618_s1 + $0x38] sm:$0xff]  ;;  %v43_v2 = vld [vmem:[%s1618_s1 + $0x30] sm:$0xff]  ;;  %v42_v4 = vld [vmem:[%s1618_s1 + $0x28] sm:$0xff] }
   0x2   :  { %v1325_v1 = vld [vmem:[%s1619_s2 + $0x18] sm:$0xff]  ;;  %79 = vmatpush.msra.mxu0 %v44_v0  ;;  %v1334_v3 = vld [vmem:[%s1619_s2 + $0x10] sm:$0xff]  ;;  %v1342_v5 = vld [vmem:[%s1619_s2 + $0x8] sm:$0xff] }
   0x3   :  { %133 = vmatpush.msra.mxu1 %v1325_v1  ;;  %202 = vmatpush.msra.mxu2 %v1325_v1  ;;  %v41_v6 = vld [vmem:[%s1618_s1 + $0x20] sm:$0xff] }
   0x4   :  { %470 = vmatpush.msra.mxu3 %v1325_v1  ;;  %80 = vmatpush.msra.mxu0 %v43_v2  ;;  %v1353_v7 = vld [vmem:[%s1619_s2] sm:$0xff] }
   0x5   :  { %134 = vmatpush.msra.mxu1 %v1334_v3  ;;  %203 = vmatpush.msra.mxu2 %v1334_v3 }
   0x6   :  { %471 = vmatpush.msra.mxu3 %v1334_v3  ;;  %81 = vmatpush.msra.mxu0 %v42_v4 }
   0x7   :  { %135 = vmatpush.msra.mxu1 %v1342_v5 }
   0x8   :  { %12 = vsyncpa [#allocation4], 0  ;;  %v40_v8 = vld [vmem:[%s1618_s1 + $0x18] sm:$0xff]  ;;  %204 = vmatpush.msra.mxu2 %v1342_v5  ;;  %472 = vmatpush.msra.mxu3 %v1342_v5  ;;  %v1271_v9 = vmov 0.0   ;;  %v39_v10 = vld [vmem:[%s1618_s1 + $0x10] sm:$0xff]  ;;  %vm46_vm0 = vcmask 523264  }
   0x9   :  { %82 = vmatpush.msra.mxu0 %v41_v6  ;;  %136 = vmatpush.msra.mxu1 %v1353_v7  ;;  %v38_v11 = vld [vmem:[%s1618_s1 + $0x8] sm:$0xff]  ;;  %v37_v12 = vld [vmem:[%s1618_s1] sm:$0xff]  ;;  %s1272_s27 = smov 64   ;;  %vm184_vm5 = vcmask 130048   ;;  %vm117_vm6 = vcmask 261120   ;;  %vm186_vm7 = vcmask 261248  }
   0xa   :  { %137 = vmatmul.f32.vlgmr.msra.gmra.mxu1 %v1271_v9  ;;  %205 = vmatpush.msra.mxu2 %v1353_v7  ;;  %v29_v13 = vld [vmem:[%s1617_s0] sm:$0xff]  ;;  %v30_v44 = vld [vmem:[%s1617_s0 + $0x8] sm:$0xff]  ;;  %s1276_s29 = smov 95   ;;  %s1055_s10 = sshll.u32 %s1624_s7, 4  ;;  %s1056_s10 = int_to_ptr.hbm [resolvable:$true] %s1055_s10 }
   0xb   :  { %83 = vmatpush.msra.mxu0 %v40_v8  ;;  %336 = vmatpush.msrb.mxu1 %v1325_v1  ;;  %v1394_v14 = vld [vmem:[%s1620_s3 + $0x1] ss:$0 sm:$0xff]  ;;  %v1401_v17 = vld [vmem:[%s1620_s3] ss:$0 sm:$0xff]  ;;  %s1273_s3 = smov 96  }
   0xc   :  { %269 = vmatpush.msrb.mxu2 %v1325_v1  ;;  %473 = vmatpush.msra.mxu3 %v1353_v7 }
   0xd   :  { %84 = vmatpush.msra.mxu0 %v39_v10  ;;  %337 = vmatpush.msrb.mxu1 %v1334_v3 }
   0xe   :  { %270 = vmatpush.msrb.mxu2 %v1334_v3 }
   0xf   :  { %85 = vmatpush.msra.mxu0 %v38_v11  ;;  %338 = vmatpush.msrb.mxu1 %v1342_v5 }
  0x10   :  { %271 = vmatpush.msrb.mxu2 %v1342_v5 }
  0x11   :  { %86 = vmatpush.msra.mxu0 %v37_v12  ;;  %339 = vmatpush.msrb.mxu1 %v1353_v7 }
  0x12   :  { %272 = vmatpush.msrb.mxu2 %v1353_v7  ;;  %1064 = vmatmul.msk.f32.vlgmr.msra.gmra.mxu0 %vm46_vm0, %v29_v13 }
  0x13   :  { %537 = vmatpush.msra.mxu1 %v1325_v1 }
  0x15   :  { %538 = vmatpush.msra.mxu1 %v1334_v3 }
  0x17   :  { %539 = vmatpush.msra.mxu1 %v1342_v5 }
  0x19   :  { %540 = vmatpush.msra.mxu1 %v1353_v7 }
  0x1a   :  { %1065 = vmatmul.msk.f32.gmra.mxu0 %vm46_vm0, %v30_v44 }
  0x87   :  { %v138_v15 = vpop.f32.mrf.mxu1 }
  0x88   :  { %v139_v16 = vadd.f32 %v1394_v14, %v138_v15  ;;  %v31_v15 = vld [vmem:[%s1617_s0 + $0x10] sm:$0xff] }
  0x89   :  { %1066 = vmatmul.msk.f32.gmra.mxu0 %vm46_vm0, %v31_v15 }
  0x8a   :  { %162 = vrot.lane.b32.xlu0 %v139_v16, %s1272_s27 }
  0x8f   :  { %v88_v18 = vpop.f32.mrf.mxu0 }
  0x90   :  { %v89_v19 = vadd.f32 %v1401_v17, %v88_v18 }
  0x92   :  { %v141_v20 = vadd.f32 %v139_v16, %v89_v19 }
  0x94   :  { %v1072_v21 = vmul.f32 -1.442695, %v141_v20 }
  0x96   :  { %1163 = vpow2.f32 %v1072_v21 }
  0x97   :  { %v91_v48 = vpop.f32.mrf.mxu0 }
  0x98   :  { %v92_v49 = vadd.f32 %v1401_v17, %v91_v48 }
  0x9c   :  { %v1164_v22 = vpop.eup %1163 }
  0x9d   :  { %v145_v23 = vadd.f32 1.0, %v1164_v22 }
  0x9f   :  { %1165 = vrcp.f32 %v145_v23  ;;  %v157_v29 = vand.u32 2147483648, %v145_v23  ;;  %vm151_vm2 = vweird.f32 %v145_v23  ;;  %v155_v30 = vand.u32 2147483647, %v145_v23 }
  0xa1   :  { %v158_v32 = vor.u32 1.1754944e-38, %v157_v29  ;;  %vm156_vm4 = vcmp.eq.f32.partialorder %v155_v30, 8.507059e+37 }
  0xa5   :  { %v1166_v24 = vpop.eup %1165 }
  0xa6   :  { %v147_v25 = vmul.f32 %v1166_v24, %v145_v23  ;;  %vm152_vm1 = vweird.f32 %v1166_v24 }
  0xa7   :  { %vm153_vm3 = vmor %vm151_vm2, %vm152_vm1 }
  0xa8   :  { %v148_v26 = vsub.f32 1.0, %v147_v25 }
  0xaa   :  { %v149_v27 = vmul.f32 %v1166_v24, %v148_v26 }
  0xac   :  { %v150_v28 = vadd.f32 %v1166_v24, %v149_v27 }
  0xae   :  { %v154_v31 = vsel %vm153_vm3, %v1166_v24, %v150_v28 }
  0xaf   :  { %v159_v34 = vsel %vm156_vm4, %v158_v32, %v154_v31 }
  0xb0   :  { %v172_v39 = vsub.f32 1.0, %v159_v34  ;;  %v178_v41 = vmul.f32 0.0, %v159_v34 }
  0xfc   :  { %v163_v33 = vpop.permute.xlu0 %162 }
  0xfd   :  { %v165_v35 = vmul.f32 %v163_v33, %v159_v34 }
  0xff   :  { %167 = vrot.lane.b32.xlu0 %v165_v35, %s1272_s27 }
 0x106   :  { %v94_v20 = vpop.f32.mrf.mxu0 }
 0x107   :  { %v95_v21 = vadd.f32 %v1401_v17, %v94_v20 }
 0x171   :  { %v168_v36 = vpop.permute.xlu0 %167 }
 0x172   :  { %v170_v37 = vadd.f32 %v168_v36, %v89_v19 }
 0x174   :  { %1167 = vtanh.f32 %v170_v37 }
 0x17a   :  { %v1168_v38 = vpop.eup %1167 }
 0x17b   :  { %174 = vrot.lane.b32.xlu1 %v1168_v38, %s1273_s3 }
 0x1ed   :  { %v175_v40 = vpop.permute.xlu1 %174 }
 0x1ee   :  { %v177_v42 = vmul.f32 %v175_v40, %v172_v39 }
 0x1f0   :  { %v179_v43 = vadd.f32 %v178_v41, %v177_v42  ;;  %v32_v42 = vld [vmem:[%s1617_s0 + $0x18] sm:$0xff] }
 0x1f1   :  { %1067 = vmatmul.msk.f32.gmra.mxu0 %vm46_vm0, %v32_v42 }
 0x1f2   :  { %181 = vrot.lane.b32.xlu1 %v179_v43, %s1273_s3 }
 0x264   :  { %v182_v45 = vpop.permute.xlu1 %181 }
 0x265   :  { %185 = vst.msk [vmem:[#allocation2] sm:$0xff] %vm184_vm5, %v182_v45  ;;  %1073 = vmatmul.msk.f32.vlgmr.msra.gmra.mxu2 %vm117_vm6, %v182_v45 }
 0x266   :  { %187 = vst.msk [vmem:[#allocation2 + $0x38] sm:$0xff] %vm186_vm7, %v182_v45  ;;  %403 = vmatpush.msra.mxu2 %v1325_v1 }
 0x268   :  { %404 = vmatpush.msra.mxu2 %v1334_v3 }
 0x26a   :  { %405 = vmatpush.msra.mxu2 %v1342_v5 }
 0x26c   :  { %406 = vmatpush.msra.mxu2 %v1353_v7 }
 0x2e8   :  { %v207_v46 = vpop.f32.mrf.mxu2 }
 0x2e9   :  { %v208_v47 = vadd.f32 %v1394_v14, %v207_v46  ;;  %v97_v46 = vpop.f32.mrf.mxu0 }
 0x2eb   :  { %231 = vrot.lane.b32.xlu2 %v208_v47, %s1272_s27  ;;  %v210_v50 = vadd.f32 %v208_v47, %v92_v49  ;;  %v98_v47 = vadd.f32 %v1401_v17, %v97_v46 }
 0x2ed   :  { %v1074_v51 = vmul.f32 -1.442695, %v210_v50 }
 0x2ef   :  { %1169 = vpow2.f32 %v1074_v51 }
 0x2f5   :  { %v1170_v52 = vpop.eup %1169 }
 0x2f6   :  { %v214_v53 = vadd.f32 1.0, %v1170_v52 }
 0x2f8   :  { %1171 = vrcp.f32 %v214_v53  ;;  %v226_v59 = vand.u32 2147483648, %v214_v53  ;;  %vm220_vm9 = vweird.f32 %v214_v53  ;;  %v224_v60 = vand.u32 2147483647, %v214_v53 }
 0x2fa   :  { %v227_v62 = vor.u32 1.1754944e-38, %v226_v59  ;;  %vm225_vm11 = vcmp.eq.f32.partialorder %v224_v60, 8.507059e+37 }
 0x2fe   :  { %v1172_v54 = vpop.eup %1171 }
 0x2ff   :  { %v216_v55 = vmul.f32 %v1172_v54, %v214_v53  ;;  %vm221_vm8 = vweird.f32 %v1172_v54 }
 0x300   :  { %vm222_vm10 = vmor %vm220_vm9, %vm221_vm8 }
 0x301   :  { %v217_v56 = vsub.f32 1.0, %v216_v55 }
 0x303   :  { %v218_v57 = vmul.f32 %v1172_v54, %v217_v56 }
 0x305   :  { %v219_v58 = vadd.f32 %v1172_v54, %v218_v57 }
 0x307   :  { %v223_v61 = vsel %vm222_vm10, %v1172_v54, %v219_v58 }
 0x308   :  { %v228_v0 = vsel %vm225_vm11, %v227_v62, %v223_v61 }
 0x309   :  { %v241_v9 = vsub.f32 1.0, %v228_v0  ;;  %v247_v11 = vmul.f32 %v228_v0, %v179_v43 }
 0x345   :  { %v232_v63 = vpop.permute.xlu2 %231 }
 0x346   :  { %v234_v2 = vmul.f32 %v232_v63, %v228_v0 }
 0x348   :  { %236 = vrot.lane.b32.xlu2 %v234_v2, %s1272_s27 }
 0x3a2   :  { %v237_v4 = vpop.permute.xlu2 %236 }
 0x3a3   :  { %v239_v6 = vadd.f32 %v237_v4, %v92_v49 }
 0x3a5   :  { %1173 = vtanh.f32 %v239_v6 }
 0x3ab   :  { %v1174_v8 = vpop.eup %1173 }
 0x3ac   :  { %243 = vrot.lane.b32.xlu0 %v1174_v8, %s1273_s3 }
 0x41e   :  { %v244_v10 = vpop.permute.xlu0 %243 }
 0x41f   :  { %v246_v12 = vmul.f32 %v244_v10, %v241_v9 }
 0x421   :  { %v248_v13 = vadd.f32 %v247_v11, %v246_v12  ;;  %v33_v12 = vld [vmem:[%s1617_s0 + $0x20] sm:$0xff] }
 0x422   :  { %1068 = vmatmul.msk.f32.gmra.mxu0 %vm46_vm0, %v33_v12 }
 0x423   :  { %250 = vrot.lane.b32.xlu1 %v248_v13, %s1273_s3 }
 0x495   :  { %v251_v16 = vpop.permute.xlu1 %250 }
 0x496   :  { %253 = vst.msk [vmem:[#allocation2 + $0x8] sm:$0xff] %vm184_vm5, %v251_v16  ;;  %1075 = vmatmul.msk.f32.vlgmr.msrb.gmra.mxu2 %vm117_vm6, %v251_v16 }
 0x497   :  { %254 = vst.msk [vmem:[#allocation2 + $0x30] sm:$0xff] %vm186_vm7, %v251_v16  ;;  %604 = vmatpush.msrb.mxu2 %v1325_v1 }
 0x499   :  { %605 = vmatpush.msrb.mxu2 %v1334_v3 }
 0x49b   :  { %606 = vmatpush.msrb.mxu2 %v1342_v5 }
 0x49d   :  { %607 = vmatpush.msrb.mxu2 %v1353_v7 }
 0x519   :  { %v274_v18 = vpop.f32.mrf.mxu2 }
 0x51a   :  { %v275_v19 = vadd.f32 %v1394_v14, %v274_v18  ;;  %v100_v18 = vpop.f32.mrf.mxu0 }
 0x51c   :  { %298 = vrot.lane.b32.xlu2 %v275_v19, %s1272_s27  ;;  %v277_v22 = vadd.f32 %v275_v19, %v95_v21  ;;  %v101_v19 = vadd.f32 %v1401_v17, %v100_v18 }
 0x51e   :  { %v1076_v23 = vmul.f32 -1.442695, %v277_v22 }
 0x520   :  { %1175 = vpow2.f32 %v1076_v23 }
 0x526   :  { %v1176_v24 = vpop.eup %1175 }
 0x527   :  { %v281_v25 = vadd.f32 1.0, %v1176_v24 }
 0x529   :  { %1177 = vrcp.f32 %v281_v25  ;;  %v293_v7 = vand.u32 2147483648, %v281_v25  ;;  %vm287_vm13 = vweird.f32 %v281_v25  ;;  %v291_v28 = vand.u32 2147483647, %v281_v25 }
 0x52b   :  { %v294_v30 = vor.u32 1.1754944e-38, %v293_v7  ;;  %vm292_vm15 = vcmp.eq.f32.partialorder %v291_v28, 8.507059e+37 }
 0x52f   :  { %v1178_v1 = vpop.eup %1177 }
 0x530   :  { %v283_v3 = vmul.f32 %v1178_v1, %v281_v25  ;;  %vm288_vm12 = vweird.f32 %v1178_v1 }
 0x531   :  { %vm289_vm14 = vmor %vm287_vm13, %vm288_vm12 }
 0x532   :  { %v284_v26 = vsub.f32 1.0, %v283_v3 }
 0x534   :  { %v285_v5 = vmul.f32 %v1178_v1, %v284_v26 }
 0x536   :  { %v286_v27 = vadd.f32 %v1178_v1, %v285_v5 }
 0x538   :  { %v290_v29 = vsel %vm289_vm14, %v1178_v1, %v286_v27 }
 0x539   :  { %v295_v32 = vsel %vm292_vm15, %v294_v30, %v290_v29 }
 0x53a   :  { %v308_v37 = vsub.f32 1.0, %v295_v32  ;;  %v314_v39 = vmul.f32 %v295_v32, %v248_v13 }
 0x576   :  { %v299_v31 = vpop.permute.xlu2 %298 }
 0x577   :  { %v301_v33 = vmul.f32 %v299_v31, %v295_v32 }
 0x579   :  { %303 = vrot.lane.b32.xlu0 %v301_v33, %s1272_s27 }
 0x5eb   :  { %v304_v34 = vpop.permute.xlu0 %303 }
 0x5ec   :  { %v306_v35 = vadd.f32 %v304_v34, %v95_v21 }
 0x5ee   :  { %1179 = vtanh.f32 %v306_v35 }
 0x5f4   :  { %v1180_v36 = vpop.eup %1179 }
 0x5f5   :  { %310 = vrot.lane.b32.xlu1 %v1180_v36, %s1273_s3 }
 0x667   :  { %v311_v38 = vpop.permute.xlu1 %310 }
 0x668   :  { %v313_v40 = vmul.f32 %v311_v38, %v308_v37 }
 0x66a   :  { %v315_v41 = vadd.f32 %v314_v39, %v313_v40  ;;  %v34_v40 = vld [vmem:[%s1617_s0 + $0x28] sm:$0xff] }
 0x66b   :  { %1069 = vmatmul.msk.f32.gmra.mxu0 %vm46_vm0, %v34_v40 }
 0x66c   :  { %317 = vrot.lane.b32.xlu2 %v315_v41, %s1273_s3 }
 0x6c6   :  { %v318_v43 = vpop.permute.xlu2 %317 }
 0x6c7   :  { %320 = vst.msk [vmem:[#allocation2 + $0x10] sm:$0xff] %vm184_vm5, %v318_v43  ;;  %1077 = vmatmul.msk.f32.vlgmr.msrb.gmra.mxu1 %vm117_vm6, %v318_v43 }
 0x6c8   :  { %321 = vst.msk [vmem:[#allocation2 + $0x28] sm:$0xff] %vm186_vm7, %v318_v43 }
 0x744   :  { %v341_v44 = vpop.f32.mrf.mxu1 }
 0x745   :  { %v342_v45 = vadd.f32 %v1394_v14, %v341_v44  ;;  %v103_v44 = vpop.f32.mrf.mxu0 }
 0x747   :  { %365 = vrot.lane.b32.xlu0 %v342_v45, %s1272_s27  ;;  %v344_v48 = vadd.f32 %v342_v45, %v98_v47  ;;  %v104_v45 = vadd.f32 %v1401_v17, %v103_v44 }
 0x749   :  { %v1078_v49 = vmul.f32 -1.442695, %v344_v48 }
 0x74b   :  { %1181 = vpow2.f32 %v1078_v49 }
 0x751   :  { %v1182_v50 = vpop.eup %1181 }
 0x752   :  { %v348_v51 = vadd.f32 1.0, %v1182_v50 }
 0x754   :  { %1183 = vrcp.f32 %v348_v51  ;;  %v360_v57 = vand.u32 2147483648, %v348_v51  ;;  %vm354_vm2 = vweird.f32 %v348_v51  ;;  %v358_v58 = vand.u32 2147483647, %v348_v51 }
 0x756   :  { %v361_v60 = vor.u32 1.1754944e-38, %v360_v57  ;;  %vm359_vm4 = vcmp.eq.f32.partialorder %v358_v58, 8.507059e+37 }
 0x75a   :  { %v1184_v52 = vpop.eup %1183 }
 0x75b   :  { %v350_v53 = vmul.f32 %v1184_v52, %v348_v51  ;;  %vm355_vm1 = vweird.f32 %v1184_v52 }
 0x75c   :  { %vm356_vm3 = vmor %vm354_vm2, %vm355_vm1 }
 0x75d   :  { %v351_v54 = vsub.f32 1.0, %v350_v53 }
 0x75f   :  { %v352_v55 = vmul.f32 %v1184_v52, %v351_v54 }
 0x761   :  { %v353_v56 = vadd.f32 %v1184_v52, %v352_v55 }
 0x763   :  { %v357_v59 = vsel %vm356_vm3, %v1184_v52, %v353_v56 }
 0x764   :  { %v362_v62 = vsel %vm359_vm4, %v361_v60, %v357_v59 }
 0x765   :  { %v375_v6 = vsub.f32 1.0, %v362_v62  ;;  %v381_v9 = vmul.f32 %v362_v62, %v315_v41 }
 0x7b9   :  { %v366_v61 = vpop.permute.xlu0 %365 }
 0x7ba   :  { %v368_v63 = vmul.f32 %v366_v61, %v362_v62 }
 0x7bc   :  { %370 = vrot.lane.b32.xlu1 %v368_v63, %s1272_s27 }
 0x82e   :  { %v371_v0 = vpop.permute.xlu1 %370 }
 0x82f   :  { %v373_v2 = vadd.f32 %v371_v0, %v98_v47 }
 0x831   :  { %1185 = vtanh.f32 %v373_v2 }
 0x837   :  { %v1186_v4 = vpop.eup %1185 }
 0x838   :  { %377 = vrot.lane.b32.xlu2 %v1186_v4, %s1273_s3 }
 0x892   :  { %v378_v8 = vpop.permute.xlu2 %377 }
 0x893   :  { %v380_v10 = vmul.f32 %v378_v8, %v375_v6 }
 0x895   :  { %v382_v11 = vadd.f32 %v381_v9, %v380_v10  ;;  %v35_v10 = vld [vmem:[%s1617_s0 + $0x30] sm:$0xff] }
 0x896   :  { %1070 = vmatmul.msk.f32.gmra.mxu0 %vm46_vm0, %v35_v10 }
 0x897   :  { %384 = vrot.lane.b32.xlu0 %v382_v11, %s1273_s3 }
 0x909   :  { %v385_v13 = vpop.permute.xlu0 %384 }
 0x90a   :  { %387 = vst.msk [vmem:[#allocation2 + $0x18] sm:$0xff] %vm184_vm5, %v385_v13  ;;  %1079 = vmatmul.msk.f32.vlgmr.msra.gmra.mxu2 %vm117_vm6, %v385_v13 }
 0x90b   :  { %388 = vst.msk [vmem:[#allocation2 + $0x20] sm:$0xff] %vm186_vm7, %v385_v13 }
 0x98d   :  { %v408_v15 = vpop.f32.mrf.mxu2 }
 0x98e   :  { %v409_v16 = vadd.f32 %v1394_v14, %v408_v15  ;;  %v106_v15 = vpop.f32.mrf.mxu0 }
 0x990   :  { %432 = vrot.lane.b32.xlu1 %v409_v16, %s1272_s27  ;;  %v411_v20 = vadd.f32 %v409_v16, %v101_v19  ;;  %v107_v16 = vadd.f32 %v1401_v17, %v106_v15 }
 0x992   :  { %v1080_v21 = vmul.f32 -1.442695, %v411_v20 }
 0x994   :  { %1187 = vpow2.f32 %v1080_v21 }
 0x99a   :  { %v1188_v22 = vpop.eup %1187 }
 0x99b   :  { %v415_v23 = vadd.f32 1.0, %v1188_v22 }
 0x99d   :  { %1189 = vrcp.f32 %v415_v23  ;;  %v427_v5 = vand.u32 2147483648, %v415_v23  ;;  %vm421_vm9 = vweird.f32 %v415_v23  ;;  %v425_v27 = vand.u32 2147483647, %v415_v23 }
 0x99f   :  { %v428_v28 = vor.u32 1.1754944e-38, %v427_v5  ;;  %vm426_vm11 = vcmp.eq.f32.partialorder %v425_v27, 8.507059e+37 }
 0x9a3   :  { %v1190_v24 = vpop.eup %1189 }
 0x9a4   :  { %v417_v25 = vmul.f32 %v1190_v24, %v415_v23  ;;  %vm422_vm8 = vweird.f32 %v1190_v24 }
 0x9a5   :  { %vm423_vm10 = vmor %vm421_vm9, %vm422_vm8 }
 0x9a6   :  { %v418_v1 = vsub.f32 1.0, %v417_v25 }
 0x9a8   :  { %v419_v3 = vmul.f32 %v1190_v24, %v418_v1 }
 0x9aa   :  { %v420_v26 = vadd.f32 %v1190_v24, %v419_v3 }
 0x9ac   :  { %v424_v7 = vsel %vm423_vm10, %v1190_v24, %v420_v26 }
 0x9ad   :  { %v429_v30 = vsel %vm426_vm11, %v428_v28, %v424_v7 }
 0x9ae   :  { %v442_v35 = vsub.f32 1.0, %v429_v30  ;;  %v448_v37 = vmul.f32 %v429_v30, %v382_v11 }
 0xa02   :  { %v433_v29 = vpop.permute.xlu1 %432 }
 0xa03   :  { %v435_v31 = vmul.f32 %v433_v29, %v429_v30 }
 0xa05   :  { %437 = vrot.lane.b32.xlu2 %v435_v31, %s1272_s27 }
 0xa5f   :  { %v438_v32 = vpop.permute.xlu2 %437 }
 0xa60   :  { %v440_v33 = vadd.f32 %v438_v32, %v101_v19 }
 0xa62   :  { %1191 = vtanh.f32 %v440_v33 }
 0xa68   :  { %v1192_v34 = vpop.eup %1191 }
 0xa69   :  { %444 = vrot.lane.b32.xlu0 %v1192_v34, %s1273_s3 }
 0xadb   :  { %v445_v36 = vpop.permute.xlu0 %444 }
 0xadc   :  { %v447_v38 = vmul.f32 %v445_v36, %v442_v35 }
 0xade   :  { %v449_v39 = vadd.f32 %v448_v37, %v447_v38  ;;  %v36_v38 = vld [vmem:[%s1617_s0 + $0x38] sm:$0xff] }
 0xadf   :  { %1071 = vmatmul.msk.f32.gmra.mxu0 %vm46_vm0, %v36_v38 }
 0xae0   :  { %451 = vrot.lane.b32.xlu1 %v449_v39, %s1273_s3 }
 0xb52   :  { %v452_v41 = vpop.permute.xlu1 %451 }
 0xb53   :  { %454 = vst.msk [vmem:[#allocation2 + $0x20] sm:$0xff] %vm184_vm5, %v452_v41  ;;  %1081 = vmatmul.msk.f32.vlgmr.msra.gmra.mxu3 %vm117_vm6, %v452_v41 }
 0xb54   :  { %455 = vst.msk [vmem:[#allocation2 + $0x18] sm:$0xff] %vm186_vm7, %v452_v41 }
 0xbd6   :  { %v475_v42 = vpop.f32.mrf.mxu3 }
 0xbd7   :  { %v476_v43 = vadd.f32 %v1394_v14, %v475_v42  ;;  %v109_v42 = vpop.f32.mrf.mxu0 }
 0xbd9   :  { %499 = vrot.lane.b32.xlu2 %v476_v43, %s1272_s27  ;;  %v478_v46 = vadd.f32 %v476_v43, %v104_v45  ;;  %v110_v43 = vadd.f32 %v1401_v17, %v109_v42 }
 0xbdb   :  { %v1082_v47 = vmul.f32 -1.442695, %v478_v46 }
 0xbdd   :  { %1193 = vpow2.f32 %v1082_v47 }
 0xbe3   :  { %v1194_v48 = vpop.eup %1193 }
 0xbe4   :  { %v482_v49 = vadd.f32 1.0, %v1194_v48 }
 0xbe6   :  { %1195 = vrcp.f32 %v482_v49  ;;  %v494_v55 = vand.u32 2147483648, %v482_v49  ;;  %vm488_vm13 = vweird.f32 %v482_v49  ;;  %v492_v56 = vand.u32 2147483647, %v482_v49 }
 0xbe8   :  { %v495_v58 = vor.u32 1.1754944e-38, %v494_v55  ;;  %vm493_vm15 = vcmp.eq.f32.partialorder %v492_v56, 8.507059e+37 }
 0xbec   :  { %v1196_v50 = vpop.eup %1195 }
 0xbed   :  { %v484_v51 = vmul.f32 %v1196_v50, %v482_v49  ;;  %vm489_vm12 = vweird.f32 %v1196_v50 }
 0xbee   :  { %vm490_vm14 = vmor %vm488_vm13, %vm489_vm12 }
 0xbef   :  { %v485_v52 = vsub.f32 1.0, %v484_v51 }
 0xbf1   :  { %v486_v53 = vmul.f32 %v1196_v50, %v485_v52 }
 0xbf3   :  { %v487_v54 = vadd.f32 %v1196_v50, %v486_v53 }
 0xbf5   :  { %v491_v57 = vsel %vm490_vm14, %v1196_v50, %v487_v54  ;;  %vm1046_vm14 = vcmask 39936  }
 0xbf6   :  { %v496_v60 = vsel %vm493_vm15, %v495_v58, %v491_v57 }
 0xbf7   :  { %v509_v2 = vsub.f32 1.0, %v496_v60  ;;  %v515_v6 = vmul.f32 %v496_v60, %v449_v39 }
 0xc33   :  { %v500_v59 = vpop.permute.xlu2 %499 }
 0xc34   :  { %v502_v61 = vmul.f32 %v500_v59, %v496_v60 }
 0xc36   :  { %504 = vrot.lane.b32.xlu0 %v502_v61, %s1272_s27 }
 0xca8   :  { %v505_v62 = vpop.permute.xlu0 %504 }
 0xca9   :  { %v507_v63 = vadd.f32 %v505_v62, %v104_v45 }
 0xcab   :  { %1197 = vtanh.f32 %v507_v63 }
 0xcb1   :  { %v1198_v0 = vpop.eup %1197 }
 0xcb2   :  { %511 = vrot.lane.b32.xlu1 %v1198_v0, %s1273_s3 }
 0xd24   :  { %v512_v4 = vpop.permute.xlu1 %511 }
 0xd25   :  { %v514_v8 = vmul.f32 %v512_v4, %v509_v2  ;;  %v668_v4 = vld [vmem:[%s1621_s4 + $0x18] sm:$0xff] }
 0xd26   :  { %709 = vmatpush.msrb.mxu3 %v668_v4 }
 0xd27   :  { %v516_v9 = vadd.f32 %v515_v6, %v514_v8  ;;  %v667_v6 = vld [vmem:[%s1621_s4 + $0x10] sm:$0xff]  ;;  %v666_v8 = vld [vmem:[%s1621_s4 + $0x8] sm:$0xff] }
 0xd28   :  { %710 = vmatpush.msrb.mxu3 %v667_v6  ;;  %v1530_v15 = vpack.i.bf16 %v667_v6, %v668_v4 }
 0xd29   :  { %518 = vrot.lane.b32.xlu2 %v516_v9, %s1273_s3 }
 0xd2a   :  { %711 = vmatpush.msrb.mxu3 %v666_v8 }
 0xd83   :  { %v519_v11 = vpop.permute.xlu2 %518 }
 0xd84   :  { %521 = vst.msk [vmem:[#allocation2 + $0x28] sm:$0xff] %vm184_vm5, %v519_v11  ;;  %1083 = vmatmul.msk.f32.vlgmr.msra.gmra.mxu1 %vm117_vm6, %v519_v11 }
 0xd85   :  { %522 = vst.msk [vmem:[#allocation2 + $0x10] sm:$0xff] %vm186_vm7, %v519_v11 }
 0xe01   :  { %v542_v12 = vpop.f32.mrf.mxu1 }
 0xe02   :  { %v543_v13 = vadd.f32 %v1394_v14, %v542_v12 }
 0xe04   :  { %566 = vrot.lane.b32.xlu0 %v543_v13, %s1272_s27  ;;  %v545_v18 = vadd.f32 %v543_v13, %v107_v16 }
 0xe06   :  { %v1084_v19 = vmul.f32 -1.442695, %v545_v18  ;;  %v1540_v18 = vld [vmem:[#allocation2 + $0x18] sm:$0xff] }
 0xe08   :  { %1199 = vpow2.f32 %v1084_v19  ;;  %v1544_v19 = vld [vmem:[#allocation2 + $0x20] sm:$0xff] }
 0xe0e   :  { %v1200_v20 = vpop.eup %1199 }
 0xe0f   :  { %v549_v21 = vadd.f32 1.0, %v1200_v20  ;;  %v1548_v20 = vld [vmem:[#allocation2 + $0x28] sm:$0xff] }
 0xe11   :  { %1201 = vrcp.f32 %v549_v21  ;;  %v561_v3 = vand.u32 2147483648, %v549_v21  ;;  %vm555_vm2 = vweird.f32 %v549_v21  ;;  %v559_v26 = vand.u32 2147483647, %v549_v21 }
 0xe13   :  { %v562_v27 = vor.u32 1.1754944e-38, %v561_v3  ;;  %vm560_vm4 = vcmp.eq.f32.partialorder %v559_v26, 8.507059e+37 }
 0xe17   :  { %v1202_v22 = vpop.eup %1201 }
 0xe18   :  { %v551_v23 = vmul.f32 %v1202_v22, %v549_v21  ;;  %vm556_vm1 = vweird.f32 %v1202_v22 }
 0xe19   :  { %vm557_vm3 = vmor %vm555_vm2, %vm556_vm1 }
 0xe1a   :  { %v552_v24 = vsub.f32 1.0, %v551_v23 }
 0xe1c   :  { %v553_v25 = vmul.f32 %v1202_v22, %v552_v24 }
 0xe1e   :  { %v554_v1 = vadd.f32 %v1202_v22, %v553_v25 }
 0xe20   :  { %v558_v5 = vsel %vm557_vm3, %v1202_v22, %v554_v1 }
 0xe21   :  { %v563_v28 = vsel %vm560_vm4, %v562_v27, %v558_v5  ;;  %v1563_v5 = vld [vmem:[%s1622_s5] ss:$0 sm:$0xff]  ;;  %s1275_s5 = smov 1  }
 0xe22   :  { %v576_v33 = vsub.f32 1.0, %v563_v28  ;;  %v582_v35 = vmul.f32 %v563_v28, %v516_v9  ;;  %v665_v9 = vld [vmem:[%s1621_s4] sm:$0xff] }
 0xe23   :  { %712 = vmatpush.msrb.mxu3 %v665_v9  ;;  %v1518_v10 = vpack.i.bf16 %v665_v9, %v666_v8 }
 0xe76   :  { %v567_v7 = vpop.permute.xlu0 %566 }
 0xe77   :  { %v569_v29 = vmul.f32 %v567_v7, %v563_v28 }
 0xe79   :  { %571 = vrot.lane.b32.xlu1 %v569_v29, %s1272_s27 }
 0xeeb   :  { %v572_v30 = vpop.permute.xlu1 %571 }
 0xeec   :  { %v574_v31 = vadd.f32 %v572_v30, %v107_v16  ;;  %v1536_v16 = vld [vmem:[#allocation2 + $0x10] sm:$0xff] }
 0xeee   :  { %1203 = vtanh.f32 %v574_v31 }
 0xef4   :  { %v1204_v32 = vpop.eup %1203 }
 0xef5   :  { %578 = vrot.lane.b32.xlu2 %v1204_v32, %s1273_s3 }
 0xf4f   :  { %v579_v34 = vpop.permute.xlu2 %578 }
 0xf50   :  { %v581_v36 = vmul.f32 %v579_v34, %v576_v33 }
 0xf52   :  { %v583_v37 = vadd.f32 %v582_v35, %v581_v36 }
 0xf54   :  { %585 = vrot.lane.b32.xlu0 %v583_v37, %s1273_s3 }
 0xfc6   :  { %v586_v39 = vpop.permute.xlu0 %585 }
 0xfc7   :  { %588 = vst.msk [vmem:[#allocation2 + $0x30] sm:$0xff] %vm184_vm5, %v586_v39  ;;  %1085 = vmatmul.msk.f32.vlgmr.msrb.gmra.mxu2 %vm117_vm6, %v586_v39 }
 0xfc8   :  { %589 = vst.msk [vmem:[#allocation2 + $0x8] sm:$0xff] %vm186_vm7, %v586_v39 }
 0xfce   :  { %v1552_v21 = vld [vmem:[#allocation2 + $0x30] sm:$0xff] }
 0xfcf   :  { %v1528_v13 = vld [vmem:[#allocation2 + $0x8] sm:$0xff] }
0x104a   :  { %v609_v40 = vpop.f32.mrf.mxu2 }
0x104b   :  { %v610_v41 = vadd.f32 %v1394_v14, %v609_v40 }
0x104d   :  { %633 = vrot.lane.b32.xlu1 %v610_v41, %s1272_s27  ;;  %v612_v44 = vadd.f32 %v610_v41, %v110_v43 }
0x104f   :  { %v1086_v45 = vmul.f32 -1.442695, %v612_v44 }
0x1051   :  { %1205 = vpow2.f32 %v1086_v45 }
0x1057   :  { %v1206_v46 = vpop.eup %1205 }
0x1058   :  { %v616_v47 = vadd.f32 1.0, %v1206_v46 }
0x105a   :  { %1207 = vrcp.f32 %v616_v47  ;;  %v628_v53 = vand.u32 2147483648, %v616_v47  ;;  %vm622_vm9 = vweird.f32 %v616_v47  ;;  %v626_v14 = vand.u32 2147483647, %v616_v47 }
0x105c   :  { %v629_v55 = vor.u32 1.1754944e-38, %v628_v53  ;;  %vm627_vm11 = vcmp.eq.f32.partialorder %v626_v14, 8.507059e+37 }
0x1060   :  { %v1208_v48 = vpop.eup %1207 }
0x1061   :  { %v618_v49 = vmul.f32 %v1208_v48, %v616_v47  ;;  %vm623_vm8 = vweird.f32 %v1208_v48 }
0x1062   :  { %vm624_vm10 = vmor %vm622_vm9, %vm623_vm8 }
0x1063   :  { %v619_v50 = vsub.f32 1.0, %v618_v49 }
0x1065   :  { %v620_v51 = vmul.f32 %v1208_v48, %v619_v50 }
0x1067   :  { %v621_v52 = vadd.f32 %v1208_v48, %v620_v51 }
0x1069   :  { %v625_v54 = vsel %vm624_vm10, %v1208_v48, %v621_v52 }
0x106a   :  { %v630_v56 = vsel %vm627_vm11, %v629_v55, %v625_v54  ;;  %v1274_v55 = vmov 0  }
0x106b   :  { %v643_v61 = vsub.f32 1.0, %v630_v56  ;;  %v649_v63 = vmul.f32 %v630_v56, %v583_v37  ;;  %1129 = vset.pattern.permute.xlu0 %v1274_v55  ;;  %1128 = vset.pattern.permute.xlu2 %v1274_v55 }
0x106c   :  { %1127 = vset.pattern.permute.xlu1 %v1274_v55 }
0x10bf   :  { %v634_v17 = vpop.permute.xlu1 %633 }
0x10c0   :  { %v636_v57 = vmul.f32 %v634_v17, %v630_v56 }
0x10c2   :  { %638 = vrot.lane.b32.xlu2 %v636_v57, %s1272_s27 }
0x10ca   :  { %1118 = vrot.lane.b32.xlu2 %v1530_v15, %s1273_s3 }
0x111c   :  { %v639_v58 = vpop.permute.xlu2 %638 }
0x111d   :  { %v641_v59 = vadd.f32 %v639_v58, %v110_v43 }
0x111f   :  { %1209 = vtanh.f32 %v641_v59 }
0x1124   :  { %v1119_v23 = vpop.permute.xlu2 %1118 }
0x1125   :  { %v1210_v60 = vpop.eup %1209  ;;  %v1121_v24 = vunpack.i.h.bf16 %v1119_v23  ;;  %v1120_v25 = vunpack.i.l.bf16 %v1119_v23 }
0x1126   :  { %645 = vrot.lane.b32.xlu0 %v1210_v60, %s1273_s3 }
0x1127   :  { %798 = vmatpush.msrb.mxu1 %v1120_v25  ;;  %1105 = vmatpush.msra.mxu2 %v1120_v25 }
0x1129   :  { %799 = vmatpush.msrb.mxu1 %v1121_v24  ;;  %1106 = vmatpush.msra.mxu2 %v1121_v24 }
0x112e   :  { %1123 = vrot.lane.b32.xlu0 %v1518_v10, %s1273_s3 }
0x1198   :  { %v646_v62 = vpop.permute.xlu0 %645 }
0x1199   :  { %v648_v0 = vmul.f32 %v646_v62, %v643_v61 }
0x119b   :  { %v650_v2 = vadd.f32 %v649_v63, %v648_v0 }
0x119d   :  { %652 = vrot.lane.b32.xlu1 %v650_v2, %s1273_s3 }
0x11a0   :  { %v1124_v1 = vpop.permute.xlu0 %1123 }
0x11a1   :  { %v1125_v3 = vunpack.i.l.bf16 %v1124_v1  ;;  %v1126_v26 = vunpack.i.h.bf16 %v1124_v1 }
0x11a3   :  { %800 = vmatpush.msrb.mxu1 %v1125_v3  ;;  %1107 = vmatpush.msra.mxu2 %v1125_v3 }
0x11a5   :  { %801 = vmatpush.msrb.mxu1 %v1126_v26  ;;  %1108 = vmatpush.msra.mxu2 %v1126_v26 }
0x120f   :  { %v653_v11 = vpop.permute.xlu1 %652 }
0x1210   :  { %655 = vst.msk [vmem:[#allocation2 + $0x38] sm:$0xff] %vm184_vm5, %v653_v11  ;;  %vm827_vm5 = vcmask 7168  }
0x1211   :  { %656 = vst.msk [vmem:[#allocation2] sm:$0xff] %vm186_vm7, %v653_v11 }
0x1217   :  { %v1556_v22 = vld [vmem:[#allocation2 + $0x38] sm:$0xff] }
0x1218   :  { %v1524_v12 = vld [vmem:[#allocation2] sm:$0xff] }
0x1219   :  { %1087 = vmatmul.msk.f32.vlgmr.msrb.gmra.mxu3 %vm117_vm6, %v1524_v12 }
0x1221   :  { %1088 = vmatmul.msk.f32.gmra.mxu3 %vm117_vm6, %v1528_v13 }
0x1229   :  { %1089 = vmatmul.msk.f32.gmra.mxu3 %vm117_vm6, %v1536_v16 }
0x1231   :  { %1090 = vmatmul.msk.f32.gmra.mxu3 %vm117_vm6, %v1540_v18 }
0x1239   :  { %1091 = vmatmul.msk.f32.gmra.mxu3 %vm117_vm6, %v1544_v19 }
0x1241   :  { %1092 = vmatmul.msk.f32.gmra.mxu3 %vm117_vm6, %v1548_v20 }
0x1249   :  { %1093 = vmatmul.msk.f32.gmra.mxu3 %vm117_vm6, %v1552_v21 }
0x1251   :  { %1094 = vmatmul.msk.f32.gmra.mxu3 %vm117_vm6, %v1556_v22 }
0x129c   :  { %v714_v27 = vpop.f32.mrf.mxu3 }
0x129d   :  { %v715_v7 = vadd.f32 %v1563_v5, %v714_v27 }
0x129f   :  { %1211 = vtanh.f32 %v715_v7 }
0x12a4   :  { %v717_v28 = vpop.f32.mrf.mxu3 }
0x12a5   :  { %v1212_v29 = vpop.eup %1211  ;;  %v718_v30 = vadd.f32 %v1563_v5, %v717_v28 }
0x12a6   :  { %1095 = vmatmul.msk.f32.vlgmr.msrb.gmra.mxu1 %vm117_vm6, %v1212_v29 }
0x12a7   :  { %1213 = vtanh.f32 %v718_v30 }
0x12ac   :  { %v720_v31 = vpop.f32.mrf.mxu3 }
0x12ad   :  { %v1214_v32 = vpop.eup %1213  ;;  %v721_v33 = vadd.f32 %v1563_v5, %v720_v31 }
0x12ae   :  { %1096 = vmatmul.msk.f32.gmra.mxu1 %vm117_vm6, %v1214_v32 }
0x12af   :  { %1215 = vtanh.f32 %v721_v33 }
0x12b4   :  { %v723_v34 = vpop.f32.mrf.mxu3 }
0x12b5   :  { %v1216_v35 = vpop.eup %1215  ;;  %v724_v36 = vadd.f32 %v1563_v5, %v723_v34 }
0x12b6   :  { %1097 = vmatmul.msk.f32.gmra.mxu1 %vm117_vm6, %v1216_v35 }
0x12b7   :  { %1217 = vtanh.f32 %v724_v36 }
0x12bc   :  { %v726_v37 = vpop.f32.mrf.mxu3 }
0x12bd   :  { %v1218_v38 = vpop.eup %1217  ;;  %v727_v39 = vadd.f32 %v1563_v5, %v726_v37 }
0x12be   :  { %1098 = vmatmul.msk.f32.gmra.mxu1 %vm117_vm6, %v1218_v38 }
0x12bf   :  { %1219 = vtanh.f32 %v727_v39 }
0x12c4   :  { %v729_v40 = vpop.f32.mrf.mxu3 }
0x12c5   :  { %v1220_v41 = vpop.eup %1219  ;;  %v730_v42 = vadd.f32 %v1563_v5, %v729_v40 }
0x12c6   :  { %1099 = vmatmul.msk.f32.gmra.mxu1 %vm117_vm6, %v1220_v41 }
0x12c7   :  { %1221 = vtanh.f32 %v730_v42 }
0x12cc   :  { %v732_v43 = vpop.f32.mrf.mxu3 }
0x12cd   :  { %v1222_v44 = vpop.eup %1221  ;;  %v733_v45 = vadd.f32 %v1563_v5, %v732_v43 }
0x12ce   :  { %1100 = vmatmul.msk.f32.gmra.mxu1 %vm117_vm6, %v1222_v44 }
0x12cf   :  { %1223 = vtanh.f32 %v733_v45 }
0x12d4   :  { %v735_v46 = vpop.f32.mrf.mxu3 }
0x12d5   :  { %v1224_v47 = vpop.eup %1223  ;;  %v736_v48 = vadd.f32 %v1563_v5, %v735_v46 }
0x12d6   :  { %1101 = vmatmul.msk.f32.vlgmr.msra.gmra.mxu2 %vm117_vm6, %v1224_v47 }
0x12d7   :  { %1225 = vtanh.f32 %v736_v48 }
0x12dd   :  { %v1226_v49 = vpop.eup %1225 }
0x12de   :  { %1102 = vmatmul.msk.f32.gmra.mxu2 %vm117_vm6, %v1226_v49 }
0x1323   :  { %v803_v50 = vpop.f32.mrf.mxu1 }
0x1324   :  { %v828_v62 = vsel %vm827_vm5, %v803_v50, -inf }
0x132b   :  { %v806_v51 = vpop.f32.mrf.mxu1 }
0x132c   :  { %v829_v57 = vsel %vm827_vm5, %v806_v51, -inf }
0x1333   :  { %v809_v52 = vpop.f32.mrf.mxu1 }
0x1334   :  { %v830_v63 = vsel %vm827_vm5, %v809_v52, -inf }
0x133b   :  { %v812_v53 = vpop.f32.mrf.mxu1 }
0x133c   :  { %v831_v0 = vsel %vm827_vm5, %v812_v53, -inf }
0x1343   :  { %v815_v14 = vpop.f32.mrf.mxu1 }
0x1344   :  { %v832_v58 = vsel %vm827_vm5, %v815_v14, -inf }
0x1345   :  { %v833_v4 = vmax.f32 %v828_v62, %v832_v58 }
0x134b   :  { %v818_v17 = vpop.f32.mrf.mxu1 }
0x134c   :  { %v834_v56 = vsel %vm827_vm5, %v818_v17, -inf }
0x134d   :  { %v835_v60 = vmax.f32 %v829_v57, %v834_v56 }
0x134f   :  { %v840_v9 = vmax.f32 %v833_v4, %v835_v60 }
0x1359   :  { %v821_v54 = vpop.f32.mrf.mxu2 }
0x135a   :  { %v836_v59 = vsel %vm827_vm5, %v821_v54, -inf }
0x135b   :  { %v837_v6 = vmax.f32 %v830_v63, %v836_v59 }
0x1361   :  { %v824_v61 = vpop.f32.mrf.mxu2 }
0x1362   :  { %v838_v2 = vsel %vm827_vm5, %v824_v61, -inf }
0x1363   :  { %v839_v8 = vmax.f32 %v831_v0, %v838_v2 }
0x1365   :  { %v841_v11 = vmax.f32 %v837_v6, %v839_v8 }
0x1367   :  { %v842_v23 = vmax.f32 %v840_v9, %v841_v11 }
0x1369   :  { %v843_v24 = vrot.slane %v842_v23, 4 }
0x136b   :  { %v844_v25 = vmax.f32 %v842_v23, %v843_v24 }
0x136d   :  { %v845_v1 = vrot.slane %v844_v25, 2 }
0x136f   :  { %v846_v3 = vmax.f32 %v844_v25, %v845_v1 }
0x1371   :  { %v847_v26 = vrot.slane %v846_v3, 1 }
0x1373   :  { %v848_v27 = vmax.f32 %v846_v3, %v847_v26 }
0x1375   :  { %v856_v7 = vsub.f32 %v824_v61, %v848_v27  ;;  %v855_v28 = vsub.f32 %v821_v54, %v848_v27  ;;  %v854_v29 = vsub.f32 %v818_v17, %v848_v27  ;;  %v853_v33 = vsub.f32 %v815_v14, %v848_v27 }
0x1376   :  { %v852_v34 = vsub.f32 %v812_v53, %v848_v27  ;;  %v849_v35 = vsub.f32 %v803_v50, %v848_v27  ;;  %v851_v42 = vsub.f32 %v809_v52, %v848_v27  ;;  %v850_v43 = vsub.f32 %v806_v51, %v848_v27 }
0x1377   :  { %v871_v30 = vmul.f32 1.442695, %v856_v7  ;;  %v869_v31 = vmul.f32 1.442695, %v855_v28  ;;  %v867_v32 = vmul.f32 1.442695, %v854_v29 }
0x1378   :  { %v865_v36 = vmul.f32 1.442695, %v853_v33  ;;  %v863_v37 = vmul.f32 1.442695, %v852_v34  ;;  %v857_v39 = vmul.f32 1.442695, %v849_v35 }
0x1379   :  { %1227 = vpow2.f32 %v871_v30  ;;  %v861_v44 = vmul.f32 1.442695, %v851_v42  ;;  %v859_v45 = vmul.f32 1.442695, %v850_v43  ;;  %v873_v29 = vld [vmem:[%s1623_s6] sm:$0xff]  ;;  %s1277_s6 = smov 127  }
0x137a   :  { %1229 = vpow2.f32 %v869_v31 }
0x137b   :  { %1231 = vpow2.f32 %v867_v32 }
0x137c   :  { %1233 = vpow2.f32 %v865_v36 }
0x137d   :  { %1235 = vpow2.f32 %v863_v37 }
0x137e   :  { %1237 = vpow2.f32 %v857_v39 }
0x137f   :  { %v1228_v38 = vpop.eup %1227  ;;  %1239 = vpow2.f32 %v861_v44 }
0x1380   :  { %v1230_v40 = vpop.eup %1229  ;;  %911 = vperm.xlu1 %1127, %v1228_v38   ;;  %1241 = vpow2.f32 %v859_v45 }
0x1381   :  { %v1232_v41 = vpop.eup %1231  ;;  %906 = vperm.xlu2 %1128, %v1230_v40  }
0x1382   :  { %901 = vperm.xlu0 %1129, %v1232_v41   ;;  %v1234_v46 = vpop.eup %1233 }
0x1383   :  { %v1236_v47 = vpop.eup %1235 }
0x1384   :  { %v1238_v48 = vpop.eup %1237 }
0x1385   :  { %v1240_v49 = vpop.eup %1239 }
0x1386   :  { %v1242_v50 = vpop.eup %1241 }
0x1388   :  { %896 = vperm.xlu1 %1127, %v1234_v46  }
0x1389   :  { %891 = vperm.xlu2 %1128, %v1236_v47  }
0x138a   :  { %876 = vperm.xlu0 %1129, %v1238_v48  }
0x1390   :  { %886 = vperm.xlu1 %1127, %v1240_v49  }
0x1391   :  { %881 = vperm.xlu2 %1128, %v1242_v50  }
0x13db   :  { %v907_v53 = vpop.permute.xlu2 %906 }
0x13dc   :  { %v920_v51 = vmul.f32 %v907_v53, %v1552_v21 }
0x13e3   :  { %v892_v52 = vpop.permute.xlu2 %891 }
0x13eb   :  { %v882_v56 = vpop.permute.xlu2 %881 }
0x13ec   :  { %v915_v61 = vmul.f32 %v882_v56, %v1528_v13 }
0x13f2   :  { %v912_v14 = vpop.permute.xlu1 %911 }
0x13f3   :  { %v921_v54 = vmul.f32 %v912_v14, %v1556_v22  ;;  %v917_v22 = vmul.f32 %v892_v52, %v1540_v18 }
0x13f4   :  { %v902_v55 = vpop.permute.xlu0 %901 }
0x13f5   :  { %v1130_v17 = vpack.i.bf16 %v920_v51, %v921_v54  ;;  %v919_v58 = vmul.f32 %v902_v55, %v1548_v20 }
0x13f7   :  { %1131 = vrot.lane.b32.xlu1 %v1130_v17, %s1275_s5 }
0x13fa   :  { %v897_v57 = vpop.permute.xlu1 %896 }
0x13fb   :  { %v918_v59 = vmul.f32 %v897_v57, %v1544_v19 }
0x13fc   :  { %v877_v60 = vpop.permute.xlu0 %876 }
0x13fd   :  { %v1135_v62 = vpack.i.bf16 %v918_v59, %v919_v58  ;;  %v914_v63 = vmul.f32 %v877_v60, %v1524_v12 }
0x13ff   :  { %v1145_v0 = vpack.i.bf16 %v914_v63, %v915_v61  ;;  %1136 = vrot.lane.b32.xlu2 %v1135_v62, %s1275_s5 }
0x1401   :  { %1146 = vrot.lane.b32.xlu1 %v1145_v0, %s1275_s5 }
0x1402   :  { %v887_v21 = vpop.permute.xlu1 %886 }
0x1403   :  { %v916_v2 = vmul.f32 %v887_v21, %v1536_v16 }
0x1405   :  { %v1140_v4 = vpack.i.bf16 %v916_v2, %v917_v22 }
0x1407   :  { %1141 = vrot.lane.b32.xlu0 %v1140_v4, %s1275_s5 }
0x1409   :  { %1156 = vrot.lane.b32.xlu1 %v1518_v10, %s1276_s29 }
0x140f   :  { %1151 = vrot.lane.b32.xlu0 %v1530_v15, %s1276_s29 }
0x1417   :  { %1021 = vrot.lane.b32.xlu0 %v1563_v5, %s1273_s3  ;;  %s1278_s3 = smov [#allocation3]  }
0x1418   :  { %s1053_s30 = sshll.u32 %s1278_s3, 4  ;;  %s1054_s30 = int_to_ptr.vmem [resolvable:$true] %s1053_s30 }
0x1459   :  { %v1137_v6 = vpop.permute.xlu2 %1136 }
0x145a   :  { %v1138_v9 = vunpack.i.l.bf16 %v1137_v6  ;;  %v1139_v11 = vunpack.i.h.bf16 %v1137_v6 }
0x145c   :  { %v959_v23 = vsel %vm827_vm5, %v1232_v41, %v1138_v9  ;;  %v958_v18 = vsel %vm827_vm5, %v1234_v46, %v1139_v11 }
0x1469   :  { %v1132_v20 = vpop.permute.xlu1 %1131 }
0x146a   :  { %v1134_v8 = vunpack.i.h.bf16 %v1132_v20  ;;  %v1133_v19 = vunpack.i.l.bf16 %v1132_v20 }
0x146c   :  { %v961_v13 = vsel %vm827_vm5, %v1228_v38, %v1133_v19  ;;  %v960_v12 = vsel %vm827_vm5, %v1230_v40, %v1134_v8 }
0x146d   :  { %973 = vmatpush.msrb.mxu2 %v961_v13 }
0x146f   :  { %974 = vmatpush.msrb.mxu2 %v960_v12 }
0x1471   :  { %975 = vmatpush.msrb.mxu2 %v959_v23 }
0x1473   :  { %976 = vmatpush.msrb.mxu2 %v958_v18  ;;  %v1147_v16 = vpop.permute.xlu1 %1146 }
0x1474   :  { %v1148_v3 = vunpack.i.l.bf16 %v1147_v16  ;;  %v1149_v27 = vunpack.i.h.bf16 %v1147_v16 }
0x1476   :  { %v955_v28 = vsel %vm827_vm5, %v1242_v50, %v1148_v3  ;;  %v954_v30 = vsel %vm827_vm5, %v1238_v48, %v1149_v27 }
0x1479   :  { %v1142_v24 = vpop.permute.xlu0 %1141 }
0x147a   :  { %v1144_v25 = vunpack.i.h.bf16 %v1142_v24  ;;  %v1143_v1 = vunpack.i.l.bf16 %v1142_v24 }
0x147b   :  { %v1157_v41 = vpop.permute.xlu1 %1156 }
0x147c   :  { %v957_v26 = vsel %vm827_vm5, %v1236_v47, %v1143_v1  ;;  %v956_v7 = vsel %vm827_vm5, %v1240_v49, %v1144_v25  ;;  %v1158_v43 = vunpack.i.l.bf16 %v1157_v41  ;;  %v1159_v44 = vunpack.i.h.bf16 %v1157_v41 }
0x147d   :  { %977 = vmatpush.msrb.mxu2 %v957_v26 }
0x147f   :  { %978 = vmatpush.msrb.mxu2 %v956_v7 }
0x1481   :  { %979 = vmatpush.msrb.mxu2 %v955_v28  ;;  %v1152_v10 = vpop.permute.xlu0 %1151 }
0x1482   :  { %v1154_v5 = vunpack.i.h.bf16 %v1152_v10  ;;  %v1153_v42 = vunpack.i.l.bf16 %v1152_v10 }
0x1483   :  { %980 = vmatpush.msrb.mxu2 %v954_v30 }
0x1484   :  { %1103 = vmatmul.msk.f32.vlgmr.msrb.gmra.mxu2 %vm46_vm0, %v873_v29 }
0x1485   :  { %1038 = vmatpush.msra.mxu2 %v1153_v42 }
0x1487   :  { %1039 = vmatpush.msra.mxu2 %v1154_v5 }
0x1489   :  { %1040 = vmatpush.msra.mxu2 %v1158_v43  ;;  %v1022_v48 = vpop.permute.xlu0 %1021 }
0x148b   :  { %1041 = vmatpush.msra.mxu2 %v1159_v44 }
0x1507   :  { %v982_v31 = vpop.f32.mrf.mxu2 }
0x1508   :  { %1243 = vrcp.f32 %v982_v31  ;;  %v996_v35 = vand.u32 2147483648, %v982_v31  ;;  %v994_v37 = vand.u32 2147483647, %v982_v31  ;;  %vm990_vm12 = vweird.f32 %v982_v31 }
0x150a   :  { %v997_v39 = vor.u32 1.1754944e-38, %v996_v35  ;;  %vm995_vm13 = vcmp.eq.f32.partialorder %v994_v37, 8.507059e+37 }
0x150e   :  { %v1244_v32 = vpop.eup %1243 }
0x150f   :  { %v986_v33 = vmul.f32 %v1244_v32, %v982_v31  ;;  %vm991_vm7 = vweird.f32 %v1244_v32 }
0x1510   :  { %vm992_vm0 = vmor %vm990_vm12, %vm991_vm7 }
0x1511   :  { %v987_v34 = vsub.f32 1.0, %v986_v33 }
0x1513   :  { %v988_v36 = vmul.f32 %v1244_v32, %v987_v34 }
0x1515   :  { %v989_v38 = vadd.f32 %v1244_v32, %v988_v36 }
0x1517   :  { %v993_v40 = vsel %vm992_vm0, %v1244_v32, %v989_v38 }
0x1518   :  { %v998_v15 = vsel %vm995_vm13, %v997_v39, %v993_v40 }
0x1519   :  { %1002 = vperm.xlu2 %1128, %v998_v15  }
0x1573   :  { %v1003_v45 = vpop.permute.xlu2 %1002 }
0x1574   :  { %v1005_v46 = vmul.f32 %v1003_v45, %v982_v31 }
0x1576   :  { %1007 = vrot.lane.b32.xlu2 %v1005_v46, %s1277_s6 }
0x15d0   :  { %v1008_v47 = vpop.permute.xlu2 %1007 }
0x15d1   :  { %1104 = vmatmul.msk.f32.vlgmr.msra.gmra.mxu2 %vm117_vm6, %v1008_v47 }
0x1654   :  { %v1043_v49 = vpop.f32.mrf.mxu2 }
0x1655   :  { %v1044_v50 = vadd.f32 %v1043_v49, %v1022_v48 }
0x1657   :  { %1047 = vst.msk [vmem:[#allocation3] sm:$0xff] %vm1046_vm14, %v1044_v50 }
0x1658   :  { %1058 = dma.vmem_to_hbm [thread:$0]  %s1054_s30, 128, %s1056_s10, [#allocation4]  }
0x1659   :  { %1269 = dma.done.wait [#allocation4], 128  }
0x165a   :  { %1270 = vsyncadd [#allocation4], 4294967168 }
0x165b   :  { %1063 = vsyncpa [#allocation4], 1 }

</bundles_post_ra>
